<compile_context>
chip_gen: v5e
topology: v5e:2x2
jax: 0.10.0
libtpu: 0.0.40
codegen_flags: <defaults>
</compile_context>

<pallas_src>
import functools

import jax
import jax.numpy as jnp
from jax.experimental import pallas as pl
from jax.experimental.pallas import tpu as pltpu


def _round_up(v, m):
    return ((v + m - 1) // m) * m


def _resblock_kernel(*refs, Cin, Cout, H, W, Bt, PADA, has_down):
    if has_down:
        x_ref, w1_ref, w2_ref, wd_ref, p_ref, out_ref, xpad_ref, mid_ref = refs
    else:
        x_ref, w1_ref, w2_ref, p_ref, out_ref, xpad_ref, mid_ref = refs
        wd_ref = None

    HW = H * W

    a1 = p_ref[0]  # PReLU slope 1
    a2 = p_ref[1]  # PReLU slope 2

    # Column-validity masks for the horizontal tap offsets dx = -1 / +1 (a flat lane shift
    # by +-1 wraps across image-row boundaries; those lanes must be zeroed).
    col = jax.lax.broadcasted_iota(jnp.int32, (1, HW), 1) % W
    m_dx_m1 = col > 0          # reading (w - 1) is valid
    m_dx_p1 = col < (W - 1)    # reading (w + 1) is valid

    def conv3x3(src_ref, w_ref):
        # src_ref: (C, HW + 2*PADA) zero-bordered flat bf16 activation in VMEM.
        # w_ref:   (Cout, 9*C) tap-major bf16 weight matrix in VMEM.
        # Single fused MXU matmul with contraction depth K = 9*C.
        slabs = []
        for t in range(9):
            dy = t // 3 - 1
            dx = t % 3 - 1
            s = dy * W + dx
            # Lane-shifted slab: value at flat position j is src[j + s] (zero in border).
            slab = src_ref[:, PADA + s:PADA + s + HW]
            if dx == -1:
                slab = jnp.where(m_dx_m1, slab, jnp.zeros_like(slab))
            elif dx == 1:
                slab = jnp.where(m_dx_p1, slab, jnp.zeros_like(slab))
            slabs.append(slab)
        rhs = jnp.concatenate(slabs, axis=0)                 # (9*C, HW) bf16, tap-major
        return jnp.dot(w_ref[...], rhs, preferred_element_type=jnp.float32)

    # Re-zero the scratch borders every grid step (required under "parallel" semantics;
    # the interior is fully overwritten below).  PADA is 128-aligned -> unmasked stores.
    xpad_ref[:, 0:PADA] = jnp.zeros((Cin, PADA), jnp.bfloat16)
    xpad_ref[:, PADA + HW:PADA + HW + PADA] = jnp.zeros((Cin, PADA), jnp.bfloat16)
    mid_ref[:, 0:PADA] = jnp.zeros((Cout, PADA), jnp.bfloat16)
    mid_ref[:, PADA + HW:PADA + HW + PADA] = jnp.zeros((Cout, PADA), jnp.bfloat16)

    for bi in range(Bt):
        x = x_ref[bi]                                        # (Cin, HW) f32

        # --- conv1 (3x3, pad=1, bias=False) + PReLU(a1) ---
        xpad_ref[:, PADA:PADA + HW] = x.astype(jnp.bfloat16)   # lane-aligned interior store
        h1 = conv3x3(xpad_ref, w1_ref)                         # (Cout, HW) f32
        h1 = jnp.where(h1 >= 0.0, h1, a1 * h1)

        # --- conv2 (3x3, pad=1, bias=False) + residual identity + PReLU(a2) ---
        mid_ref[:, PADA:PADA + HW] = h1.astype(jnp.bfloat16)
        h2 = conv3x3(mid_ref, w2_ref)
        if has_down:
            ident = jnp.dot(wd_ref[...], x.astype(jnp.bfloat16),
                            preferred_element_type=jnp.float32)   # 1x1 conv
        else:
            ident = x
        h2 = h2 + ident
        out_ref[bi, :, :] = jnp.where(h2 >= 0.0, h2, a2 * h2)


def resblock_pallas(x, w1, w2, wd, a1, a2, stride=1, batch_tile=1):
    """Pallas ResBlock forward.

    x:  (B, Cin, H, W)                       -- NCHW, like PyTorch
    w1: (Cout, Cin, 3, 3)   conv1 weight (bias=False)
    w2: (Cout, Cout, 3, 3)  conv2 weight (bias=False)
    wd: (Cout, Cin, 1, 1) or None            -- 1x1 downsample weight if Cin != Cout
    a1, a2: PReLU slopes (scalars; nn.PReLU() default has a single parameter)
    """
    assert stride == 1  # TODO(synk): stride != 1 not implemented
    B, Cin, H, W = x.shape
    Cout = w1.shape[0]
    has_down = wd is not None
    if not has_down:
        assert Cin == Cout
    HW = H * W
    PADA = _round_up(W + 1, 128)     # lane-aligned zero border (covers max tap shift W+1)
    HWp = HW + 2 * PADA

    bt = batch_tile
    assert B % bt == 0

    # Channel padding to a multiple of 16 (bf16 sublane packing); no-op for typical C.
    CP = 16
    Cin_p = _round_up(Cin, CP)
    Cout_p = _round_up(Cout, CP)

    # Free reshape (contiguous): lane-dense flat spatial axis; zero-pad channels.
    x_flat = x.reshape(B, Cin, HW).astype(jnp.float32)
    x_flat = jnp.pad(x_flat, ((0, 0), (0, Cin_p - Cin), (0, 0)))

    # (Cout, Cin, 3, 3) -> tap-major (Cout_p, 9*Cin_p) bf16 weight matrix.
    def flat3x3(w, co_p, ci_p):
        co, ci = w.shape[0], w.shape[1]
        wt = jnp.transpose(w, (0, 2, 3, 1))                      # (co, 3, 3, ci)
        wt = jnp.pad(wt, ((0, co_p - co), (0, 0), (0, 0), (0, ci_p - ci)))
        return wt.reshape(co_p, 9 * ci_p).astype(jnp.bfloat16)

    w1_f = flat3x3(w1, Cout_p, Cin_p)
    w2_f = flat3x3(w2, Cout_p, Cout_p)
    params = jnp.array([a1, a2], dtype=jnp.float32)

    inputs = [x_flat, w1_f, w2_f]
    in_specs = [
        pl.BlockSpec((bt, Cin_p, HW), lambda b: (b, 0, 0)),
        pl.BlockSpec((Cout_p, 9 * Cin_p), lambda b: (0, 0)),
        pl.BlockSpec((Cout_p, 9 * Cout_p), lambda b: (0, 0)),
    ]
    if has_down:
        wd_f = jnp.pad(wd.reshape(Cout, Cin),
                       ((0, Cout_p - Cout), (0, Cin_p - Cin))).astype(jnp.bfloat16)
        inputs.append(wd_f)
        in_specs.append(pl.BlockSpec((Cout_p, Cin_p), lambda b: (0, 0)))
    inputs.append(params)
    in_specs.append(pl.BlockSpec(params.shape, lambda b: (0,), memory_space=pltpu.SMEM))

    kernel = functools.partial(
        _resblock_kernel, Cin=Cin_p, Cout=Cout_p, H=H, W=W, Bt=bt, PADA=PADA,
        has_down=has_down)

    flops = 2 * B * HW * (Cout_p * 9 * Cin_p + Cout_p * 9 * Cout_p
                          + (Cout_p * Cin_p if has_down else 0))
    bytes_accessed = (x_flat.size * 4 + B * Cout_p * HW * 4
                      + w1_f.size * 2 + w2_f.size * 2
                      + (Cout_p * Cin_p * 2 if has_down else 0))

    out_flat = pl.pallas_call(
        kernel,
        out_shape=jax.ShapeDtypeStruct((B, Cout_p, HW), jnp.float32),
        grid=(B // bt,),
        in_specs=in_specs,
        out_specs=pl.BlockSpec((bt, Cout_p, HW), lambda b: (b, 0, 0)),
        scratch_shapes=[
            pltpu.VMEM((Cin_p, HWp), jnp.bfloat16),    # zero-bordered flat x (bf16)
            pltpu.VMEM((Cout_p, HWp), jnp.bfloat16),   # zero-bordered flat conv1 out (bf16)
        ],
        compiler_params=pltpu.CompilerParams(
            dimension_semantics=("parallel",),
            vmem_limit_bytes=48 * 1024 * 1024),
        cost_estimate=pl.CostEstimate(
            flops=flops, transcendentals=0, bytes_accessed=bytes_accessed),
    )(*inputs)
    return out_flat[:, :Cout, :].reshape(B, Cout, H, W)


# ----------------------- pure-JAX reference (for checking) -----------------------
def _conv2d_ref(x, w, stride=1, pad=1):
    return jax.lax.conv_general_dilated(
        x, w, window_strides=(stride, stride),
        padding=((pad, pad), (pad, pad)),
        dimension_numbers=("NCHW", "OIHW", "NCHW"))


def _prelu(x, a):
    return jnp.where(x >= 0, x, a * x)


def resblock_ref(x, w1, w2, wd, a1, a2):
    out = _prelu(_conv2d_ref(x, w1), a1)
    out = _conv2d_ref(out, w2)
    ident = x if wd is None else _conv2d_ref(x, wd, pad=0)
    return _prelu(out + ident, a2)


if __name__ == "__main__":
    key = jax.random.PRNGKey(0)
    k1, k2, k3, k4 = jax.random.split(key, 4)

    B, C, H, W = 2, 4, 16, 16
    x = jax.random.normal(k1, (B, C, H, W), dtype=jnp.float32)
    a1 = 0.25   # nn.PReLU() default init
    a2 = 0.25

    # bf16 MXU operands (f32 accumulation) -> loosened tolerances vs. f32 reference.
    ATOL = 5e-2
    RTOL = 5e-2

    # Case 1: in_nc == out_nc (downsample is None)
    w1 = jax.random.normal(k2, (C, C, 3, 3), dtype=jnp.float32) * 0.1
    w2 = jax.random.normal(k3, (C, C, 3, 3), dtype=jnp.float32) * 0.1
    out = jax.block_until_ready(resblock_pallas(x, w1, w2, None, a1, a2))
    ref = resblock_ref(x, w1, w2, None, a1, a2)
    assert out.shape == (B, C, H, W)
    assert jnp.allclose(out, ref, atol=ATOL, rtol=RTOL), float(jnp.max(jnp.abs(out - ref)))

    # Case 2: in_nc != out_nc (1x1 conv downsample on the identity branch)
    Cout = 8
    w1b = jax.random.normal(k4, (Cout, C, 3, 3), dtype=jnp.float32) * 0.1
    w2b = jax.random.normal(k2, (Cout, Cout, 3, 3), dtype=jnp.float32) * 0.1
    wdb = jax.random.normal(k3, (Cout, C, 1, 1), dtype=jnp.float32) * 0.1
    out2 = jax.block_until_ready(resblock_pallas(x, w1b, w2b, wdb, a1, a2))
    ref2 = resblock_ref(x, w1b, w2b, wdb, a1, a2)
    assert out2.shape == (B, Cout, H, W)
    assert jnp.allclose(out2, ref2, atol=ATOL, rtol=RTOL), float(jnp.max(jnp.abs(out2 - ref2)))

    print("KERNEL_OK")
</pallas_src>

<mosaic_0001>
module attributes {stable_mosaic.version = 11 : i64} {
  func.func @_resblock_kernel(%arg0: i32, %arg1: memref<1x16x256xf32, #tpu.memory_space<vmem>>, %arg2: memref<16x144xbf16, #tpu.memory_space<vmem>>, %arg3: memref<16x144xbf16, #tpu.memory_space<vmem>>, %arg4: memref<2xf32, #tpu.memory_space<smem>>, %arg5: memref<1x16x256xf32, #tpu.memory_space<vmem>>, %arg6: memref<16x512xbf16, #tpu.memory_space<vmem>>, %arg7: memref<16x512xbf16, #tpu.memory_space<vmem>>) attributes {dimension_semantics = [#tpu.dimension_semantics<parallel>], iteration_bounds = array<i64: 2>, scalar_prefetch = 0 : i64, scratch_operands = 2 : i64, tpu.core_type = #tpu.core_type<tc>, window_params = [{transform_indices = @transform_0, window_bounds = array<i64: 1, 16, 256>}, {pipeline_mode = #tpu.pipeline_mode<synchronous>, transform_indices = @transform_1, window_bounds = array<i64: 16, 144>}, {pipeline_mode = #tpu.pipeline_mode<synchronous>, transform_indices = @transform_2, window_bounds = array<i64: 16, 144>}, {transform_indices = @transform_3, window_bounds = array<i64: 2>}, {transform_indices = @transform_4, window_bounds = array<i64: 1, 16, 256>}]} {
    %c0 = arith.constant 0 : index
    %0 = memref.load %arg4[%c0] : memref<2xf32, #tpu.memory_space<smem>>
    %c1 = arith.constant 1 : index
    %1 = memref.load %arg4[%c1] : memref<2xf32, #tpu.memory_space<smem>>
    %2 = tpu.iota {dimensions = array<i32: 1>} : vector<1x256xi32>
    %c16_i32 = arith.constant 16 : i32
    %c0_i32 = arith.constant 0 : i32
    %3 = arith.cmpi eq, %c16_i32, %c0_i32 : i32
    %c1_i32 = arith.constant 1 : i32
    %4 = arith.select %3, %c1_i32, %c16_i32 : i32
    %5 = vector.broadcast %4 : i32 to vector<1x256xi32>
    %6 = arith.remsi %2, %5 : vector<1x256xi32>
    %c0_i32_0 = arith.constant 0 : i32
    %7 = vector.broadcast %c0_i32_0 : i32 to vector<1x256xi32>
    %8 = arith.cmpi ne, %6, %7 : vector<1x256xi32>
    %c0_i32_1 = arith.constant 0 : i32
    %9 = vector.broadcast %c0_i32_1 : i32 to vector<1x256xi32>
    %10 = arith.cmpi slt, %6, %9 : vector<1x256xi32>
    %c0_i32_2 = arith.constant 0 : i32
    %11 = arith.cmpi slt, %4, %c0_i32_2 : i32
    %12 = vector.broadcast %11 : i1 to vector<1x256xi1>
    %13 = vector.broadcast %12 : vector<1x256xi1> to vector<1x256xi1>
    %14 = arith.xori %10, %13 : vector<1x256xi1>
    %15 = arith.andi %14, %8 : vector<1x256xi1>
    %16 = vector.broadcast %4 : i32 to vector<1x256xi32>
    %17 = arith.addi %6, %16 : vector<1x256xi32>
    %18 = arith.select %15, %17, %6 : vector<1x256xi1>, vector<1x256xi32>
    %c0_i32_3 = arith.constant 0 : i32
    %19 = vector.broadcast %c0_i32_3 : i32 to vector<1x256xi32>
    %20 = arith.cmpi sgt, %18, %19 : vector<1x256xi32>
    %c15_i32 = arith.constant 15 : i32
    %21 = vector.broadcast %c15_i32 : i32 to vector<1x256xi32>
    %22 = arith.cmpi slt, %18, %21 : vector<1x256xi32>
    %cst = arith.constant 0.000000e+00 : bf16
    %23 = vector.broadcast %cst : bf16 to vector<16x128xbf16>
    %c0_4 = arith.constant 0 : index
    %c0_5 = arith.constant 0 : index
    %24 = vector.load %arg6[%c0_4, %c0_5] : memref<16x512xbf16, #tpu.memory_space<vmem>>, vector<16x128xbf16>
    tpu.vector_store %arg6[%c0_4, %c0_5], %23 {strides = array<i32>} : memref<16x512xbf16, #tpu.memory_space<vmem>>, vector<16x128xbf16>,
    %cst_6 = arith.constant 0.000000e+00 : bf16
    %25 = vector.broadcast %cst_6 : bf16 to vector<16x128xbf16>
    %c0_7 = arith.constant 0 : index
    %c384 = arith.constant 384 : index
    %26 = vector.load %arg6[%c0_7, %c384] : memref<16x512xbf16, #tpu.memory_space<vmem>>, vector<16x128xbf16>
    tpu.vector_store %arg6[%c0_7, %c384], %25 {strides = array<i32>} : memref<16x512xbf16, #tpu.memory_space<vmem>>, vector<16x128xbf16>,
    %cst_8 = arith.constant 0.000000e+00 : bf16
    %27 = vector.broadcast %cst_8 : bf16 to vector<16x128xbf16>
    %c0_9 = arith.constant 0 : index
    %c0_10 = arith.constant 0 : index
    %28 = vector.load %arg7[%c0_9, %c0_10] : memref<16x512xbf16, #tpu.memory_space<vmem>>, vector<16x128xbf16>
    tpu.vector_store %arg7[%c0_9, %c0_10], %27 {strides = array<i32>} : memref<16x512xbf16, #tpu.memory_space<vmem>>, vector<16x128xbf16>,
    %cst_11 = arith.constant 0.000000e+00 : bf16
    %29 = vector.broadcast %cst_11 : bf16 to vector<16x128xbf16>
    %c0_12 = arith.constant 0 : index
    %c384_13 = arith.constant 384 : index
    %30 = vector.load %arg7[%c0_12, %c384_13] : memref<16x512xbf16, #tpu.memory_space<vmem>>, vector<16x128xbf16>
    tpu.vector_store %arg7[%c0_12, %c384_13], %29 {strides = array<i32>} : memref<16x512xbf16, #tpu.memory_space<vmem>>, vector<16x128xbf16>,
    %c0_14 = arith.constant 0 : index
    %c0_15 = arith.constant 0 : index
    %c0_16 = arith.constant 0 : index
    %31 = vector.load %arg1[%c0_14, %c0_15, %c0_16] : memref<1x16x256xf32, #tpu.memory_space<vmem>>, vector<1x16x256xf32>
    %32 = vector.shape_cast %31 : vector<1x16x256xf32> to vector<16x256xf32>
    %33 = arith.truncf %32 : vector<16x256xf32> to vector<16x256xbf16>
    %c0_17 = arith.constant 0 : index
    %c128 = arith.constant 128 : index
    %34 = vector.load %arg6[%c0_17, %c128] : memref<16x512xbf16, #tpu.memory_space<vmem>>, vector<16x256xbf16>
    tpu.vector_store %arg6[%c0_17, %c128], %33 {strides = array<i32>} : memref<16x512xbf16, #tpu.memory_space<vmem>>, vector<16x256xbf16>,
    %c0_18 = arith.constant 0 : index
    %c111 = arith.constant 111 : index
    %35 = vector.load %arg6[%c0_18, %c111] : memref<16x512xbf16, #tpu.memory_space<vmem>>, vector<16x256xbf16>
    %cst_19 = arith.constant 0.000000e+00 : bf16
    %36 = vector.broadcast %cst_19 : bf16 to vector<16x256xbf16>
    %37 = vector.shape_cast %20 : vector<1x256xi1> to vector<1x256xi1>
    %38 = vector.broadcast %37 : vector<1x256xi1> to vector<16x256xi1>
    %39 = arith.select %38, %35, %36 : vector<16x256xi1>, vector<16x256xbf16>
    %c0_20 = arith.constant 0 : index
    %c112 = arith.constant 112 : index
    %40 = vector.load %arg6[%c0_20, %c112] : memref<16x512xbf16, #tpu.memory_space<vmem>>, vector<16x256xbf16>
    %c0_21 = arith.constant 0 : index
    %c113 = arith.constant 113 : index
    %41 = vector.load %arg6[%c0_21, %c113] : memref<16x512xbf16, #tpu.memory_space<vmem>>, vector<16x256xbf16>
    %cst_22 = arith.constant 0.000000e+00 : bf16
    %42 = vector.broadcast %cst_22 : bf16 to vector<16x256xbf16>
    %43 = vector.shape_cast %22 : vector<1x256xi1> to vector<1x256xi1>
    %44 = vector.broadcast %43 : vector<1x256xi1> to vector<16x256xi1>
    %45 = arith.select %44, %41, %42 : vector<16x256xi1>, vector<16x256xbf16>
    %c0_23 = arith.constant 0 : index
    %c127 = arith.constant 127 : index
    %46 = vector.load %arg6[%c0_23, %c127] : memref<16x512xbf16, #tpu.memory_space<vmem>>, vector<16x256xbf16>
    %cst_24 = arith.constant 0.000000e+00 : bf16
    %47 = vector.broadcast %cst_24 : bf16 to vector<16x256xbf16>
    %48 = vector.shape_cast %20 : vector<1x256xi1> to vector<1x256xi1>
    %49 = vector.broadcast %48 : vector<1x256xi1> to vector<16x256xi1>
    %50 = arith.select %49, %46, %47 : vector<16x256xi1>, vector<16x256xbf16>
    %c0_25 = arith.constant 0 : index
    %c128_26 = arith.constant 128 : index
    %51 = vector.load %arg6[%c0_25, %c128_26] : memref<16x512xbf16, #tpu.memory_space<vmem>>, vector<16x256xbf16>
    %c0_27 = arith.constant 0 : index
    %c129 = arith.constant 129 : index
    %52 = vector.load %arg6[%c0_27, %c129] : memref<16x512xbf16, #tpu.memory_space<vmem>>, vector<16x256xbf16>
    %cst_28 = arith.constant 0.000000e+00 : bf16
    %53 = vector.broadcast %cst_28 : bf16 to vector<16x256xbf16>
    %54 = vector.shape_cast %22 : vector<1x256xi1> to vector<1x256xi1>
    %55 = vector.broadcast %54 : vector<1x256xi1> to vector<16x256xi1>
    %56 = arith.select %55, %52, %53 : vector<16x256xi1>, vector<16x256xbf16>
    %c0_29 = arith.constant 0 : index
    %c143 = arith.constant 143 : index
    %57 = vector.load %arg6[%c0_29, %c143] : memref<16x512xbf16, #tpu.memory_space<vmem>>, vector<16x256xbf16>
    %cst_30 = arith.constant 0.000000e+00 : bf16
    %58 = vector.broadcast %cst_30 : bf16 to vector<16x256xbf16>
    %59 = vector.shape_cast %20 : vector<1x256xi1> to vector<1x256xi1>
    %60 = vector.broadcast %59 : vector<1x256xi1> to vector<16x256xi1>
    %61 = arith.select %60, %57, %58 : vector<16x256xi1>, vector<16x256xbf16>
    %c0_31 = arith.constant 0 : index
    %c144 = arith.constant 144 : index
    %62 = vector.load %arg6[%c0_31, %c144] : memref<16x512xbf16, #tpu.memory_space<vmem>>, vector<16x256xbf16>
    %c0_32 = arith.constant 0 : index
    %c145 = arith.constant 145 : index
    %63 = vector.load %arg6[%c0_32, %c145] : memref<16x512xbf16, #tpu.memory_space<vmem>>, vector<16x256xbf16>
    %cst_33 = arith.constant 0.000000e+00 : bf16
    %64 = vector.broadcast %cst_33 : bf16 to vector<16x256xbf16>
    %65 = vector.shape_cast %22 : vector<1x256xi1> to vector<1x256xi1>
    %66 = vector.broadcast %65 : vector<1x256xi1> to vector<16x256xi1>
    %67 = arith.select %66, %63, %64 : vector<16x256xi1>, vector<16x256xbf16>
    %68 = tpu.concatenate %39, %40, %45, %50, %51, %56, %61, %62, %67 in 0 : vector<16x256xbf16>, vector<16x256xbf16>, vector<16x256xbf16>, vector<16x256xbf16>, vector<16x256xbf16>, vector<16x256xbf16>, vector<16x256xbf16>, vector<16x256xbf16>, vector<16x256xbf16> -> vector<144x256xbf16>
    %c0_34 = arith.constant 0 : index
    %c0_35 = arith.constant 0 : index
    %69 = vector.load %arg2[%c0_34, %c0_35] : memref<16x144xbf16, #tpu.memory_space<vmem>>, vector<16x144xbf16>
    %cst_36 = arith.constant dense<0.000000e+00> : vector<16x256xf32>
    %70 = tpu.matmul %69, %68, %cst_36 {dimension_numbers = #tpu.dot_dimension_numbers<[1], [0], [0], [1], [0, 0, 1, 1], [], []>} : vector<16x144xbf16>, vector<144x256xbf16>, vector<16x256xf32> -> vector<16x256xf32>
    %cst_37 = arith.constant 0.000000e+00 : f32
    %71 = vector.broadcast %cst_37 : f32 to vector<16x256xf32>
    %72 = arith.cmpf oge, %70, %71 : vector<16x256xf32>
    %73 = vector.broadcast %0 : f32 to vector<16x256xf32>
    %74 = arith.mulf %73, %70 : vector<16x256xf32>
    %75 = arith.select %72, %70, %74 : vector<16x256xi1>, vector<16x256xf32>
    %76 = arith.truncf %75 : vector<16x256xf32> to vector<16x256xbf16>
    %c0_38 = arith.constant 0 : index
    %c128_39 = arith.constant 128 : index
    %77 = vector.load %arg7[%c0_38, %c128_39] : memref<16x512xbf16, #tpu.memory_space<vmem>>, vector<16x256xbf16>
    tpu.vector_store %arg7[%c0_38, %c128_39], %76 {strides = array<i32>} : memref<16x512xbf16, #tpu.memory_space<vmem>>, vector<16x256xbf16>,
    %c0_40 = arith.constant 0 : index
    %c111_41 = arith.constant 111 : index
    %78 = vector.load %arg7[%c0_40, %c111_41] : memref<16x512xbf16, #tpu.memory_space<vmem>>, vector<16x256xbf16>
    %cst_42 = arith.constant 0.000000e+00 : bf16
    %79 = vector.broadcast %cst_42 : bf16 to vector<16x256xbf16>
    %80 = vector.shape_cast %20 : vector<1x256xi1> to vector<1x256xi1>
    %81 = vector.broadcast %80 : vector<1x256xi1> to vector<16x256xi1>
    %82 = arith.select %81, %78, %79 : vector<16x256xi1>, vector<16x256xbf16>
    %c0_43 = arith.constant 0 : index
    %c112_44 = arith.constant 112 : index
    %83 = vector.load %arg7[%c0_43, %c112_44] : memref<16x512xbf16, #tpu.memory_space<vmem>>, vector<16x256xbf16>
    %c0_45 = arith.constant 0 : index
    %c113_46 = arith.constant 113 : index
    %84 = vector.load %arg7[%c0_45, %c113_46] : memref<16x512xbf16, #tpu.memory_space<vmem>>, vector<16x256xbf16>
    %cst_47 = arith.constant 0.000000e+00 : bf16
    %85 = vector.broadcast %cst_47 : bf16 to vector<16x256xbf16>
    %86 = vector.shape_cast %22 : vector<1x256xi1> to vector<1x256xi1>
    %87 = vector.broadcast %86 : vector<1x256xi1> to vector<16x256xi1>
    %88 = arith.select %87, %84, %85 : vector<16x256xi1>, vector<16x256xbf16>
    %c0_48 = arith.constant 0 : index
    %c127_49 = arith.constant 127 : index
    %89 = vector.load %arg7[%c0_48, %c127_49] : memref<16x512xbf16, #tpu.memory_space<vmem>>, vector<16x256xbf16>
    %cst_50 = arith.constant 0.000000e+00 : bf16
    %90 = vector.broadcast %cst_50 : bf16 to vector<16x256xbf16>
    %91 = vector.shape_cast %20 : vector<1x256xi1> to vector<1x256xi1>
    %92 = vector.broadcast %91 : vector<1x256xi1> to vector<16x256xi1>
    %93 = arith.select %92, %89, %90 : vector<16x256xi1>, vector<16x256xbf16>
    %c0_51 = arith.constant 0 : index
    %c128_52 = arith.constant 128 : index
    %94 = vector.load %arg7[%c0_51, %c128_52] : memref<16x512xbf16, #tpu.memory_space<vmem>>, vector<16x256xbf16>
    %c0_53 = arith.constant 0 : index
    %c129_54 = arith.constant 129 : index
    %95 = vector.load %arg7[%c0_53, %c129_54] : memref<16x512xbf16, #tpu.memory_space<vmem>>, vector<16x256xbf16>
    %cst_55 = arith.constant 0.000000e+00 : bf16
    %96 = vector.broadcast %cst_55 : bf16 to vector<16x256xbf16>
    %97 = vector.shape_cast %22 : vector<1x256xi1> to vector<1x256xi1>
    %98 = vector.broadcast %97 : vector<1x256xi1> to vector<16x256xi1>
    %99 = arith.select %98, %95, %96 : vector<16x256xi1>, vector<16x256xbf16>
    %c0_56 = arith.constant 0 : index
    %c143_57 = arith.constant 143 : index
    %100 = vector.load %arg7[%c0_56, %c143_57] : memref<16x512xbf16, #tpu.memory_space<vmem>>, vector<16x256xbf16>
    %cst_58 = arith.constant 0.000000e+00 : bf16
    %101 = vector.broadcast %cst_58 : bf16 to vector<16x256xbf16>
    %102 = vector.shape_cast %20 : vector<1x256xi1> to vector<1x256xi1>
    %103 = vector.broadcast %102 : vector<1x256xi1> to vector<16x256xi1>
    %104 = arith.select %103, %100, %101 : vector<16x256xi1>, vector<16x256xbf16>
    %c0_59 = arith.constant 0 : index
    %c144_60 = arith.constant 144 : index
    %105 = vector.load %arg7[%c0_59, %c144_60] : memref<16x512xbf16, #tpu.memory_space<vmem>>, vector<16x256xbf16>
    %c0_61 = arith.constant 0 : index
    %c145_62 = arith.constant 145 : index
    %106 = vector.load %arg7[%c0_61, %c145_62] : memref<16x512xbf16, #tpu.memory_space<vmem>>, vector<16x256xbf16>
    %cst_63 = arith.constant 0.000000e+00 : bf16
    %107 = vector.broadcast %cst_63 : bf16 to vector<16x256xbf16>
    %108 = vector.shape_cast %22 : vector<1x256xi1> to vector<1x256xi1>
    %109 = vector.broadcast %108 : vector<1x256xi1> to vector<16x256xi1>
    %110 = arith.select %109, %106, %107 : vector<16x256xi1>, vector<16x256xbf16>
    %111 = tpu.concatenate %82, %83, %88, %93, %94, %99, %104, %105, %110 in 0 : vector<16x256xbf16>, vector<16x256xbf16>, vector<16x256xbf16>, vector<16x256xbf16>, vector<16x256xbf16>, vector<16x256xbf16>, vector<16x256xbf16>, vector<16x256xbf16>, vector<16x256xbf16> -> vector<144x256xbf16>
    %c0_64 = arith.constant 0 : index
    %c0_65 = arith.constant 0 : index
    %112 = vector.load %arg3[%c0_64, %c0_65] : memref<16x144xbf16, #tpu.memory_space<vmem>>, vector<16x144xbf16>
    %cst_66 = arith.constant dense<0.000000e+00> : vector<16x256xf32>
    %113 = tpu.matmul %112, %111, %cst_66 {dimension_numbers = #tpu.dot_dimension_numbers<[1], [0], [0], [1], [0, 0, 1, 1], [], []>} : vector<16x144xbf16>, vector<144x256xbf16>, vector<16x256xf32> -> vector<16x256xf32>
    %114 = arith.addf %113, %32 : vector<16x256xf32>
    %cst_67 = arith.constant 0.000000e+00 : f32
    %115 = vector.broadcast %cst_67 : f32 to vector<16x256xf32>
    %116 = arith.cmpf oge, %114, %115 : vector<16x256xf32>
    %117 = vector.broadcast %1 : f32 to vector<16x256xf32>
    %118 = arith.mulf %117, %114 : vector<16x256xf32>
    %119 = arith.select %116, %114, %118 : vector<16x256xi1>, vector<16x256xf32>
    %c0_68 = arith.constant 0 : index
    %c0_69 = arith.constant 0 : index
    %c0_70 = arith.constant 0 : index
    %120 = vector.load %arg5[%c0_68, %c0_69, %c0_70] : memref<1x16x256xf32, #tpu.memory_space<vmem>>, vector<1x16x256xf32>
    %121 = vector.shape_cast %120 : vector<1x16x256xf32> to vector<16x256xf32>
    %122 = vector.shape_cast %119 : vector<16x256xf32> to vector<1x16x256xf32>
    tpu.vector_store %arg5[%c0_68, %c0_69, %c0_70], %122 {strides = array<i32>} : memref<1x16x256xf32, #tpu.memory_space<vmem>>, vector<1x16x256xf32>,
    return
  }
  func.func @transform_0(%arg0: i32) -> (i32, i32, i32) {
    %c0_i32 = arith.constant 0 : i32
    %c0_i32_0 = arith.constant 0 : i32
    %c0_i32_1 = arith.constant 0 : i32
    return %arg0, %c0_i32, %c0_i32_0 : i32, i32, i32
  }
  func.func @transform_1(%arg0: i32) -> (i32, i32) {
    %c0_i32 = arith.constant 0 : i32
    %c0_i32_0 = arith.constant 0 : i32
    %c0_i32_1 = arith.constant 0 : i32
    return %c0_i32, %c0_i32_0 : i32, i32
  }
  func.func @transform_2(%arg0: i32) -> (i32, i32) {
    %c0_i32 = arith.constant 0 : i32
    %c0_i32_0 = arith.constant 0 : i32
    %c0_i32_1 = arith.constant 0 : i32
    return %c0_i32, %c0_i32_0 : i32, i32
  }
  func.func @transform_3(%arg0: i32) -> i32 {
    %c0_i32 = arith.constant 0 : i32
    %c0_i32_0 = arith.constant 0 : i32
    return %c0_i32 : i32
  }
  func.func @transform_4(%arg0: i32) -> (i32, i32, i32) {
    %c0_i32 = arith.constant 0 : i32
    %c0_i32_0 = arith.constant 0 : i32
    %c0_i32_1 = arith.constant 0 : i32
    return %arg0, %c0_i32, %c0_i32_0 : i32, i32, i32
  }
}

</mosaic_0001>

<bundles_post_ra>
// kernel: tpu_custom_call.1
= control target key start
LH: loop header
LB: loop body
LE: loop exit
PB: predicated region body
PF: predicated region fallthrough
CT: control target
= control target key end

     0   :  { %9 = vsyncpa [#allocation5], 0  ;;  %s2466_s0 = inlined_call_operand.hbm [shape: f32[2,16,256], index: 0, kind: input, shape index: {}]   ;;  %s2467_s1 = inlined_call_operand.hbm [shape: bf16[16,144], index: 1, kind: input, shape index: {}]   ;;  %s2468_s2 = inlined_call_operand.hbm [shape: bf16[16,144], index: 2, kind: input, shape index: {}]   ;;  %s2469_s3 = inlined_call_operand.vmem [shape: f32[2], index: 3, kind: input, shape index: {}]   ;;  %s2470_s4 = inlined_call_operand.hbm [shape: f32[2,16,256], index: 4, kind: output, shape index: {}]  }
   0x1   :  { %11 = vsyncpa [#allocation5 + $0x1], 0 }
   0x2   :  { %12 = vsyncpa [#allocation9], 0 }
   0x3   :  { %13 = vsyncpa [#allocation7], 0 }
   0x4   :  { %14 = vsyncpa [#allocation6], 0 }
   0x5   :  { %16 = vsyncpa [#allocation6 + $0x1], 0  ;;  %s1793_s15 = smov 0   ;;  %s1795_s16 = smov 0  }
   0x6   :  { %s1797_s17 = smov 0   ;;  %s1799_s18 = smov 0  }
   0x7 LB: > { %s1814_s19 = sadd.s32 4294967295, %s1744_s18   ;;  %s1338_s20 = sadd.s32 4294967294, %s1744_s18   ;;  %s1744_s18 = sphi %s1799_s18, %s2561_s18   ;;  %s1740_s17 = sphi %s1797_s17, %s2560_s17   ;;  %s1736_s16 = sphi %s1795_s16, %s2559_s16   ;;  %s1732_s15 = sphi %s1793_s15, %s2558_s15  }
   0x8   : > { %p42_p0 = scmp.ne.s32.totalorder %s1736_s16, %s1732_s15  ;;  %p43_p1 = scmp.eq.s32.totalorder %s1814_s19, 0 }
   0x9   : > { %p129_p2 = scmp.eq.s32.totalorder %s1814_s19, 1  ;;  %p135_p3 = scmp.eq.s32.totalorder %s1338_s20, 1 }
   0xa   : > { %p1823_p4 = por %p43_p1, %p42_p0  ;;  %p1339_p5 = scmp.ge.s32.totalorder %s1744_s18, 1 }
   0xb   : > { %p1828_p6 = por %p135_p3, %p42_p0  ;;  %p142_p7 = scmp.lt.s32.totalorder %s1744_s18, 3 }
   0xc   : > { %s153_s25 = sshll.u32 %s2467_s1, 4  ;;  %s1746_s27 = smov [#allocation8]   ;;  %s154_s25 = int_to_ptr.hbm [resolvable:$true] %s153_s25 }
   0xd   : > { %p1836_p8 = pnand %p1339_p5, %p142_p7  ;;  %s155_s28 = sshll.u32 %s1746_s27, 4  ;;  %s156_s28 = int_to_ptr.vmem [resolvable:$true] %s155_s28 }
   0xe   : > { %s167_s6 = sshll.u32 %s2468_s2, 4  ;;  %s1747_s7 = smov 128   ;;  %s168_s6 = int_to_ptr.hbm [resolvable:$true] %s167_s6 }
   0xf   : > { %p1481_p9 = pneg %p1836_p8  ;;  %s1748_s8 = smov 8  }
  0x10   : > { %s1749_s9 = smov [#allocation10]   ;;  %s182_s13 = sshll.u32 %s2469_s3, 4  ;;  %s183_s13 = int_to_ptr.vmem [resolvable:$true] %s182_s13 }
  0x11   : > { %p1844_p10 = pnand %p1481_p9, %p43_p1  ;;  %s169_s10 = sshll.u32 %s1749_s9, 4  ;;  %s170_s10 = int_to_ptr.vmem [resolvable:$true] %s169_s10 }
  0x12   : > { %s1750_s14 = smov [#allocation11]   ;;  %s1862_s20 = sadd.s32 1, %s1744_s18  }
  0x13   : > { %1484 = dma.hbm_to_vmem [thread:$0]  (!%p1844_p10), %s154_s25, 256, %s156_s28, [#allocation9], %s1747_s7, %s1747_s7, %s1748_s8  }
  0x14   : > { %1487 = dma.hbm_to_vmem [thread:$0]  (!%p1844_p10), %s168_s6, 256, %s170_s10, [#allocation9], %s1747_s7, %s1747_s7, %s1748_s8  }
  0x15   : > { %1490 = dma.vmem_to_smem (!%p1844_p10), %s183_s13, 16, %s1750_s14, [#allocation7]  }
  0x16   : > { %s26_s23 = ssub.s32 %s1744_s18, %s1862_s20  ;;  %s29_s24 = sadd.s32 1, %s1740_s17 }
  0x17   : > { %p27_p12 = scmp.eq.s32.totalorder %s26_s23, 0  ;;  %p36_p13 = scmp.ne.s32.totalorder %s1740_s17, %s1736_s16 }
  0x18   : > { %p37_p0 = scmp.eq.s32.totalorder %s1744_s18, 0  ;;  %p1502_p3 = scmp.lt.s32.totalorder %s1744_s18, 2 }
  0x19   : > { %s1872_s25 = scalar_select %p27_p12, %s1740_s17, %s29_s24  }
  0x1a   : > { %p38_p5 = por %p37_p0, %p36_p13  ;;  %p1876_p7 = por %p129_p2, %p36_p13 }
  0x1b   : > { %s193_s28 = sand.u32 1, %s1740_s17   ;;  %s1443_s29 = sshll.u32 %s1744_s18, 5 }
  0x1c   : > { %s1344_s30 = sshll.u32 %s193_s28, 5  ;;  %s202_s7 = scalar_lea.hbm %s2466_s0, %s1443_s29 }
  0x1d   : > { %s203_s8 = sshll.u32 %s202_s7, 4  ;;  %s197_s9 = scalar_lea.vmem [#allocation4], %s1344_s30  ;;  %s204_s8 = int_to_ptr.hbm [resolvable:$true] %s203_s8 }
  0x1e   : > { %s205_s10 = sshll.u32 %s197_s9, 4  ;;  %p1887_p9 = pnand %p1502_p3, %p38_p5  ;;  %s206_s10 = int_to_ptr.vmem [resolvable:$true] %s205_s10 }
  0x1f   : > { %s194_s12 = scalar_lea.sflag [#allocation5], %s193_s28  ;;  %s1640_s13 = sshra.s32 %s204_s8, 4  ;;  %s1641_s13 = int_to_ptr.hbm [resolvable:$true] %s1640_s13 }
  0x20   : > { %s1642_s14 = scalar_lea.hbm %s1641_s13, 32  ;;  %p1644_p10 = pneg %p1887_p9 }
  0x21   : > { %p1643_p2 = scmp.ne.s32.totalorder %s1641_s13, %s1642_s14  ;;  %s1647_s29 = scalar_lea.hbm %s2466_s0, 64 }
  0x22   : > { %p1648_p0 = scmp.lt.s32.totalorder %s1641_s13, %s2466_s0  ;;  %p1649_p3 = scmp.lt.s32.totalorder %s1647_s29, %s1642_s14 }
  0x23   : > { %p1645_p12 = pnand %p1644_p10, %p1643_p2 }
  0x24   : > { %p1650_p5 = por %p1649_p3, %p1648_p0 }
  0x25   : > { %p1646_p13 = pneg %p1645_p12 }
  0x27   : > { %p1651_p11 = pnand %p1650_p5, %p1646_p13 }
  0x29   : > { %1654 = shalt.err (!%p1651_p11)
}
  0x2a   : > { %s1751_s28 = smov 256   ;;  %s1752_s6 = smov 16  }
  0x2b   : > { %1494 = dma.hbm_to_vmem [thread:$0]  (!%p1887_p9), %s204_s8, 512, %s206_s10, %s194_s12, %s1751_s28, %s1751_s28, %s1752_s6  }
  0x2c   : > { %217 = sbr.rel (%p1836_p8) target bundleno = 1135 (0x46f), region = 36  ;;  %s1904_s7 = sand.u32 (!%p1836_p8), 1, %s1736_s16  }
  0x2d   : > { %s1348_s9 = sshll.u32 (!%p1836_p8), %s1904_s7, 5  ;;  %s220_s13 = scalar_lea.sflag (!%p1836_p8), [#allocation5], %s1904_s7 }
  0x2e   : > { %s1910_s14 = scalar_lea.vmem (!%p1836_p8), [#allocation4], %s1348_s9 }
  0x31   : > { %1715 = dma.done.wait (%p1823_p4), %s220_s13, 512  }
  0x32   : > { %1717 = vsyncadd (%p1823_p4), %s220_s13, 4294966784 }
  0x33   : > { %1719 = dma.done.wait (%p43_p1), [#allocation9], 512  }
  0x34   : > { %1721 = vsyncadd (%p43_p1), [#allocation9], 4294966784 }
  0x35   : > { %1723 = dma.done.wait (%p43_p1), [#allocation7], 16  }
  0x36   : > { %1725 = vsyncadd (%p43_p1), [#allocation7], 4294967280 }
  0x37   : > { %244 = sfence }
  0x38   : > { %v270_v0 = vlaneseq  ;;  %v1753_v1 = vmov 0   ;;  %v309_v3 = vld [vmem:[%s1910_s14] sm:$0xff]  ;;  %v310_v4 = vld [vmem:[%s1910_s14 + $0x8] sm:$0xff]  ;;  %v311_v5 = vld [vmem:[%s1910_s14 + $0x10] sm:$0xff]  ;;  %s1754_s21 = smov 127   ;;  %s1755_s26 = smov 15  }
  0x39   : > { %301 = vst [vmem:[#allocation2] sm:$0xf] %v1753_v1  ;;  %v312_v6 = vld [vmem:[%s1910_s14 + $0x18] sm:$0xff]  ;;  %v1933_v9 = vpack.c.bf16 %v310_v4, %v309_v3  ;;  %s1756_s8 = smov 17   ;;  %s1757_s10 = smov 113   ;;  %vm434_vm6 = vcmask 121856   ;;  %v1957_v37 = vunpack.c.l.b16 %v1753_v1  ;;  %v1960_v38 = vunpack.c.h.b16 %v1753_v1 }
  0x3a   : > { %v271_v2 = vand.u32 127, %v270_v0  ;;  %302 = vst [vmem:[#allocation2 + $0x10] sm:$0xf] %v1753_v1  ;;  %v1936_v11 = vpack.c.bf16 %v312_v6, %v311_v5  ;;  %s1758_s11 = smov 1   ;;  %s1759_s12 = smov 95   ;;  %vm411_vm15 = vcmask 7168  }
  0x3b   : > { %303 = vst [vmem:[#allocation2 + $0xc] sm:$0xf] %v1753_v1  ;;  %s1760_s23 = smov 111   ;;  %s1761_s24 = smov 112  }
  0x3c   : > { %v272_v7 = vadd.s32 128, %v271_v2  ;;  %v277_v8 = vand.u32 15, %v271_v2  ;;  %304 = vst [vmem:[#allocation2 + $0x1c] sm:$0xf] %v1753_v1  ;;  %s1762_s29 = smov 96   ;;  %s1763_s30 = smov 126  }
  0x3d   : > { %305 = vst [vmem:[#allocation3] sm:$0xf] %v1753_v1  ;;  %s1764_s5 = smov 110   ;;  %s1765_s28 = smov 94  }
  0x3e   : > { %v284_v10 = vand.u32 15, %v272_v7  ;;  %vm297_vm0 = vcmp.gt.s32.totalorder %v277_v8, 0  ;;  %306 = vst [vmem:[#allocation3 + $0x10] sm:$0xf] %v1753_v1  ;;  %vm299_vm1 = vcmp.lt.s32.totalorder %v277_v8, 15  ;;  %s268_s6 = sld [smem:[#allocation11]] }
  0x3f   : > { %307 = vst [vmem:[#allocation3 + $0xc] sm:$0xf] %v1753_v1  ;;  %s1353_s13 = sld [smem:[#allocation11 + $0x1]] }
  0x40   : > { %vm298_vm2 = vcmp.gt.s32.totalorder %v284_v10, 0  ;;  %308 = vst [vmem:[#allocation3 + $0x1c] sm:$0xf] %v1753_v1  ;;  %vm300_vm3 = vcmp.lt.s32.totalorder %v284_v10, 15 }
  0x41   : > { %vm325_vm4 = vmpackc.low %vm298_vm2, %vm297_vm0  ;;  %315 = vst [vmem:[#allocation2 + $0x4] sm:$0xff] %v1933_v9 }
  0x42   : > { %v326_v12 = vsel %vm325_vm4, 65537, %v1753_v1  ;;  %vm354_vm5 = vmpackc.low %vm300_vm3, %vm299_vm1  ;;  %316 = vst [vmem:[#allocation2 + $0x14] sm:$0xff] %v1936_v11  ;;  %v1384_v17 = vld [vmem:[#allocation2 + $0xc] sm:$0xf]  ;;  %vm2476_vm3 = vcmask 1039360  }
  0x43   : > { %379 = vrot.lane.b32.xlu1 %v326_v12, %s1754_s21  ;;  %431 = vrot.lane.b32.xlu0 %v326_v12, %s1755_s26  ;;  %v355_v13 = vsel %vm354_vm5, 65537, %v1753_v1  ;;  %v1451_v18 = vld [vmem:[#allocation2 + $0x18] sm:$0xf0]  ;;  %v2000_v61 = vld [vmem:[#allocation2 + $0xc] sm:$0xf] }
  0x44   : > { %454 = vrot.lane.b32.xlu2 %v355_v13, %s1756_s8  ;;  %v1385_v23 = vor.u32 %v1451_v18, %v1384_v17  ;;  %v2002_v62 = vld [vmem:[#allocation2 + $0x1c] sm:$0xf] }
  0x48   : > { %v1376_v14 = vld [vmem:[#allocation2 + $0x4] sm:$0xf]  ;;  %v1449_v19 = vld [vmem:[#allocation2 + $0x8] sm:$0xf] }
  0x49   : > { %v1450_v15 = vld [vmem:[#allocation2 + $0x10] sm:$0xf0]  ;;  %v1378_v20 = vld [vmem:[#allocation2 + $0x14] sm:$0xf0]  ;;  %v1368_v21 = vld [vmem:[#allocation2 + $0x4] sm:$0xf] }
  0x4a   : > { %v1377_v16 = vor.u32 %v1450_v15, %v1376_v14  ;;  %v1448_v22 = vld [vmem:[#allocation2 + $0x10] sm:$0xf0]  ;;  %v1381_v24 = vor.u32 %v1449_v19, %v1378_v20  ;;  %v1447_v26 = vld [vmem:[#allocation2 + $0x8] sm:$0xf]  ;;  %v1370_v27 = vld [vmem:[#allocation2 + $0x14] sm:$0xf0] }
  0x4b   : > { %356 = vrot.lane.b32.xlu1 %v355_v13, %s1757_s10  ;;  %408 = vrot.lane.b32.xlu0 %v355_v13, %s1758_s11  ;;  %v1369_v25 = vor.u32 %v1448_v22, %v1368_v21  ;;  %v1373_v28 = vor.u32 %v1447_v26, %v1370_v27  ;;  %v1364_v29 = vld [vmem:[#allocation2 + $0x8] sm:$0xf]  ;;  %v1446_v30 = vld [vmem:[#allocation2 + $0x14] sm:$0xf0]  ;;  %v1444_v31 = vld [vmem:[#allocation2 + $0x4] sm:$0xf] }
  0x4c   : > { %625 = vrot.lane.b32.xlu2 %v1377_v16, %s1759_s12  ;;  %v1365_v32 = vor.u32 %v1446_v30, %v1364_v29  ;;  %v1358_v33 = vld [vmem:[#allocation2 + $0x10] sm:$0xf0]  ;;  %v1967_v46 = vld [vmem:[#allocation2 + $0x8] sm:$0xf]  ;;  %v1969_v47 = vld [vmem:[#allocation2 + $0x18] sm:$0xf] }
  0x4d   : > { %v1361_v34 = vor.u32 %v1444_v31, %v1358_v33  ;;  %v2492_v13 = vmov 0 }
  0x53   : > { %629 = vrot.lane.b32.xlu1 %v1385_v23, %s1759_s12  ;;  %627 = vrot.lane.b32.xlu0 %v1381_v24, %s1759_s12 }
  0x54   : > { %563 = vrot.lane.b32.xlu2 %v1369_v25, %s1760_s23 }
  0x5b   : > { %565 = vrot.lane.b32.xlu0 %v1373_v28, %s1760_s23  ;;  %507 = vrot.lane.b32.xlu1 %v1365_v32, %s1754_s21 }
  0x63   : > { %327 = vrot.lane.b32.xlu0 %v326_v12, %s1760_s23 }
  0x6b   : > { %505 = vrot.lane.b32.xlu0 %v1361_v34, %s1754_s21 }
  0x9e   : > { %v455_v17 = vpop.permute.xlu2 %454 }
  0x9f   : > { %v456_v20 = vrot.slane %v455_v17, 4 }
  0xb5   : > { %v1954_v35 = vpop.permute.xlu1 %379  ;;  %v432_v36 = vpop.permute.xlu0 %431 }
  0xb6   : > { %v1963_v39 = vrot.slane %v1954_v35, 4  ;;  %v433_v40 = vrot.slane %v432_v36, 4 }
  0xb8   : > { %v391_v41 = vunpack.c.l.b16 %v1963_v39  ;;  %v392_v42 = vunpack.c.h.b16 %v1963_v39  ;;  %v435_v43 = vsel %vm434_vm6, %v433_v40, %v432_v36  ;;  %v443_v48 = vunpack.c.l.b16 %v433_v40 }
  0xb9   : > { %v436_v44 = vunpack.c.l.b16 %v435_v43  ;;  %v437_v45 = vunpack.c.h.b16 %v435_v43  ;;  %v444_v49 = vunpack.c.h.b16 %v433_v40  ;;  %v467_v43 = vunpack.c.h.b16 %v456_v20 }
  0xba   : > { %vm395_vm7 = vcmp.ne.s32.totalorder %v391_v41, %v1957_v37  ;;  %vm396_vm8 = vcmp.ne.s32.totalorder %v392_v42, %v1960_v38  ;;  %vm447_vm12 = vcmp.ne.s32.totalorder %v443_v48, %v1957_v37  ;;  %v383_v41 = vsel %vm2476_vm3, %v1963_v39, %v1954_v35 }
  0xbb   : > { %vm1973_vm9 = vmpackc.low %vm396_vm8, %vm395_vm7  ;;  %vm440_vm10 = vcmp.ne.s32.totalorder %v436_v44, %v1957_v37  ;;  %vm441_vm11 = vcmp.ne.s32.totalorder %v437_v45, %v1960_v38  ;;  %vm448_vm13 = vcmp.ne.s32.totalorder %v444_v49, %v1960_v38  ;;  %v466_v42 = vunpack.c.l.b16 %v456_v20 }
  0xbc   : > { %v399_v51 = vsel %vm1973_vm9, %v1967_v46, 0  ;;  %v401_v52 = vsel %vm1973_vm9, %v1969_v47, 0  ;;  %vm1987_vm14 = vmpackc.low %vm441_vm11, %vm440_vm10  ;;  %v384_v49 = vunpack.c.l.b16 %v383_v41 }
  0xbd   : > { %v1991_v54 = vpop.permute.xlu1 %356  ;;  %v409_v55 = vpop.permute.xlu0 %408  ;;  %v539_v56 = vunpack.c.l.b16 %v399_v51  ;;  %v542_v57 = vunpack.c.l.b16 %v401_v52  ;;  %vm1993_vm0 = vmpackc.low %vm448_vm13, %vm447_vm12  ;;  %v2007_v0 = vsel %vm1987_vm14, %v1933_v9, 0  ;;  %v452_v4 = vsel %vm1987_vm14, %v1936_v11, 0 }
  0xbe   : > { %v1998_v59 = vrot.slane %v1991_v54, 4  ;;  %v410_v60 = vrot.slane %v409_v55, 4  ;;  %v451_v7 = vsel %vm1993_vm0, %v2000_v61, 0  ;;  %v453_v8 = vsel %vm1993_vm0, %v2002_v62, 0 }
  0xbf   : > { %v545_v63 = vpack.c.b16 %v542_v57, %v539_v56  ;;  %v595_v14 = vunpack.c.h.b16 %v2007_v0  ;;  %v596_v15 = vunpack.c.l.b16 %v451_v7  ;;  %v599_v16 = vunpack.c.l.b16 %v453_v8 }
  0xc0   : > { %v368_v1 = vunpack.c.l.b16 %v1998_v59  ;;  %v369_v2 = vunpack.c.h.b16 %v1998_v59  ;;  %v412_v3 = vsel %vm411_vm15, %v410_v60, %v409_v55  ;;  %v420_v10 = vunpack.c.l.b16 %v410_v60 }
  0xc1   : > { %v413_v5 = vunpack.c.l.b16 %v412_v3  ;;  %v414_v6 = vunpack.c.h.b16 %v412_v3  ;;  %550 = vrot.lane.b32.xlu2 %v545_v63, %s1761_s24  ;;  %v421_v12 = vunpack.c.h.b16 %v410_v60  ;;  %v598_v19 = vunpack.c.h.b16 %v452_v4  ;;  %v2079_v63 = vpop.permute.xlu2 %625 }
  0xc2   : > { %vm372_vm1 = vcmp.ne.s32.totalorder %v368_v1, %v1957_v37  ;;  %vm373_vm2 = vcmp.ne.s32.totalorder %v369_v2, %v1960_v38  ;;  %vm424_vm7 = vcmp.ne.s32.totalorder %v420_v10, %v1957_v37  ;;  %v602_v24 = vpack.c.b16 %v599_v16, %v596_v15 }
  0xc3   : > { %vm2023_vm4 = vmpackc.low %vm373_vm2, %vm372_vm1  ;;  %vm417_vm5 = vcmp.ne.s32.totalorder %v413_v5, %v1957_v37  ;;  %vm418_vm6 = vcmp.ne.s32.totalorder %v414_v6, %v1960_v38  ;;  %vm425_vm8 = vcmp.ne.s32.totalorder %v421_v12, %v1960_v38  ;;  %v601_v28 = vpack.c.b16 %v598_v19, %v595_v14 }
  0xc4   : > { %v2493_v13 = vsel %vm2023_vm4, 4294967295, %v2492_v13  ;;  %vm2032_vm10 = vmpackc.low %vm418_vm6, %vm417_vm5  ;;  %v376_v21 = vsel %vm2023_vm4, %v1967_v46, 0  ;;  %v378_v22 = vsel %vm2023_vm4, %v1969_v47, 0  ;;  %607 = vrot.lane.b32.xlu1 %v602_v24, %s1762_s29  ;;  %v594_v45 = vunpack.c.l.b16 %v2007_v0 }
  0xc5   : > { %vm2042_vm11 = vmpackc.low %vm425_vm8, %vm424_vm7  ;;  %v517_v25 = vunpack.c.l.b16 %v376_v21  ;;  %v520_v26 = vunpack.c.l.b16 %v378_v22  ;;  %v427_v27 = vsel %vm2032_vm10, %v1933_v9, 0  ;;  %v429_v31 = vsel %vm2032_vm10, %v1936_v11, 0  ;;  %605 = vrot.lane.b32.xlu0 %v601_v28, %s1762_s29  ;;  %v630_v56 = vpop.permute.xlu1 %629  ;;  %v628_v57 = vpop.permute.xlu0 %627 }
  0xc6   : > { %v428_v29 = vsel %vm2042_vm11, %v2000_v61, 0  ;;  %v430_v30 = vsel %vm2042_vm11, %v2002_v62, 0  ;;  %v573_v36 = vunpack.c.h.b16 %v427_v27  ;;  %v576_v40 = vunpack.c.h.b16 %v429_v31 }
  0xc7   : > { %v523_v32 = vpack.c.b16 %v520_v26, %v517_v25  ;;  %v574_v33 = vunpack.c.l.b16 %v428_v29  ;;  %v577_v34 = vunpack.c.l.b16 %v430_v30  ;;  %v597_v48 = vunpack.c.l.b16 %v452_v4 }
  0xc8   : > { %v385_v51 = vunpack.c.h.b16 %v383_v41  ;;  %v579_v52 = vpack.c.b16 %v576_v40, %v573_v36  ;;  %vm2475_vm12 = vcmask 138240   ;;  %vm359_vm13 = vcmask 924672  }
  0xc9   : > { %528 = vrot.lane.b32.xlu2 %v523_v32, %s1763_s30  ;;  %v580_v44 = vpack.c.b16 %v577_v34, %v574_v33  ;;  %vm470_vm15 = vcmp.ne.s32.totalorder %v466_v42, %v1957_v37  ;;  %vm471_vm1 = vcmp.ne.s32.totalorder %v467_v43, %v1960_v38  ;;  %v600_v35 = vpack.c.b16 %v597_v48, %v594_v45  ;;  %v1445_v33 = vld [vmem:[#allocation2 + $0xc] sm:$0xf0] }
  0xca   : > { %vm388_vm2 = vcmp.ne.s32.totalorder %v384_v49, %v1957_v37  ;;  %vm389_vm5 = vcmp.ne.s32.totalorder %v385_v51, %v1960_v38  ;;  %v458_v39 = vsel %vm2475_vm12, %v456_v20, %v455_v17  ;;  %v360_v55 = vsel %vm359_vm13, %v1998_v59, %v1991_v54  ;;  %vm2075_vm7 = vmpackc.low %vm471_vm1, %vm470_vm15  ;;  %v2085_v54 = vld [vmem:[#allocation2] sm:$0xff]  ;;  %v2087_v59 = vld [vmem:[#allocation2 + $0x10] sm:$0xff] }
  0xcb   : > { %vm2471_vm6 = vcmask 777216   ;;  %vm2081_vm8 = vmpackc.low %vm389_vm5, %vm388_vm2  ;;  %v459_v1 = vunpack.c.l.b16 %v458_v39  ;;  %v460_v2 = vunpack.c.h.b16 %v458_v39  ;;  %v572_v3 = vunpack.c.l.b16 %v427_v27 }
  0xcc   : > { %585 = vrot.lane.b32.xlu1 %v580_v44, %s1764_s5  ;;  %v575_v4 = vunpack.c.l.b16 %v429_v31  ;;  %v361_v5 = vunpack.c.l.b16 %v360_v55  ;;  %v362_v6 = vunpack.c.h.b16 %v360_v55  ;;  %v633_v7 = vsel %vm2471_vm6, %v628_v57, %v630_v56  ;;  %v2137_v44 = vpop.permute.xlu2 %563 }
  0xcd   : > { %583 = vrot.lane.b32.xlu0 %v579_v52, %s1764_s5  ;;  %v632_v8 = vsel %vm2471_vm6, %v2079_v63, %v628_v57  ;;  %v398_v10 = vsel %vm2081_vm8, %v2085_v54, 0  ;;  %v400_v12 = vsel %vm2081_vm8, %v2087_v59, 0  ;;  %v474_v14 = vsel %vm2075_vm7, %v2000_v61, 0  ;;  %v566_v24 = vpop.permute.xlu0 %565 }
  0xce   : > { %v476_v15 = vsel %vm2075_vm7, %v2002_v62, 0  ;;  %vm463_vm13 = vcmp.ne.s32.totalorder %v459_v1, %v1957_v37  ;;  %vm464_vm15 = vcmp.ne.s32.totalorder %v460_v2, %v1960_v38  ;;  %v578_v16 = vpack.c.b16 %v575_v4, %v572_v3  ;;  %v508_v2 = vpop.permute.xlu1 %507 }
  0xcf   : > { %vm365_vm1 = vcmp.ne.s32.totalorder %v361_v5, %v1957_v37  ;;  %vm366_vm2 = vcmp.ne.s32.totalorder %v362_v6, %v1960_v38  ;;  %v538_v61 = vunpack.c.h.b16 %v398_v10  ;;  %v541_v17 = vunpack.c.h.b16 %v400_v12  ;;  %vm2111_vm5 = vmpackc.low %vm464_vm15, %vm463_vm13 }
  0xd0   : > { %v640_v19 = vunpack.c.l.b16 %v474_v14  ;;  %v643_v20 = vunpack.c.l.b16 %v476_v15  ;;  %vm2115_vm6 = vmpackc.low %vm366_vm2, %vm365_vm1  ;;  %v473_v26 = vsel %vm2111_vm5, %v1933_v9, 0  ;;  %v475_v27 = vsel %vm2111_vm5, %v1936_v11, 0  ;;  %v1356_v11 = vld [vmem:[#allocation2] sm:$0xf] }
  0xd1   : > { %603 = vrot.lane.b32.xlu2 %v600_v35, %s1762_s29  ;;  %v544_v22 = vpack.c.b16 %v541_v17, %v538_v61  ;;  %v375_v28 = vsel %vm2115_vm6, %v2085_v54, 0  ;;  %v377_v29 = vsel %vm2115_vm6, %v2087_v59, 0  ;;  %v638_v30 = vunpack.c.l.b16 %v473_v26 }
  0xd2   : > { %v646_v25 = vpack.c.b16 %v643_v20, %v640_v19  ;;  %v641_v31 = vunpack.c.l.b16 %v475_v27  ;;  %v516_v9 = vunpack.c.h.b16 %v375_v28  ;;  %v519_v32 = vunpack.c.h.b16 %v377_v29 }
  0xd3   : > { %v1357_v40 = vor.u32 %v1445_v33, %v1356_v11  ;;  %v639_v41 = vunpack.c.h.b16 %v473_v26  ;;  %v642_v42 = vunpack.c.h.b16 %v475_v27  ;;  %vm2474_vm13 = vcmask 908288  }
  0xd4   : > { %713 = vrot.lane.b32.xlu1 %v633_v7, %s1756_s8  ;;  %v644_v34 = vpack.c.b16 %v641_v31, %v638_v30  ;;  %v522_v36 = vpack.c.b16 %v519_v32, %v516_v9  ;;  %v567_v45 = vsel %vm2474_vm13, %v2137_v44, %v566_v24  ;;  %v537_v48 = vunpack.c.l.b16 %v398_v10 }
  0xd5   : > { %711 = vrot.lane.b32.xlu0 %v632_v8, %s1756_s8  ;;  %v645_v43 = vpack.c.b16 %v642_v42, %v639_v41  ;;  %v540_v49 = vunpack.c.l.b16 %v400_v12  ;;  %v515_v52 = vunpack.c.l.b16 %v375_v28  ;;  %v518_v35 = vunpack.c.l.b16 %v377_v29  ;;  %v328_v57 = vpop.permute.xlu0 %327 }
  0xd6   : > { %vm2473_vm15 = vcmask 785408   ;;  %vm2472_vm1 = vcmask 900096   ;;  %v329_v61 = vrot.slane %v328_v57, 4  ;;  %vm2479_vm2 = vcmask 916480  }
  0xd7   : > { %v543_v51 = vpack.c.b16 %v540_v49, %v537_v48  ;;  %v521_v39 = vpack.c.b16 %v518_v35, %v515_v52 }
  0xd8   : > { %v339_v28 = vunpack.c.l.b16 %v329_v61  ;;  %v340_v29 = vunpack.c.h.b16 %v329_v61 }
  0xd9   : > { %581 = vrot.lane.b32.xlu2 %v578_v16, %s1764_s5 }
  0xdc   : > { %548 = vrot.lane.b32.xlu1 %v544_v22, %s1761_s24 }
  0xdd   : > { %695 = vrot.lane.b32.xlu0 %v566_v24, %s1756_s8  ;;  %v2150_v3 = vpop.permute.xlu0 %505 }
  0xde   : > { %v510_v20 = vsel %vm2476_vm3, %v2150_v3, %v508_v2 }
  0xe1   : > { %651 = vrot.lane.b32.xlu2 %v646_v25, %s1765_s28  ;;  %v331_v25 = vsel %vm2474_vm13, %v329_v61, %v328_v57  ;;  %vm343_vm13 = vcmp.ne.s32.totalorder %v339_v28, %v1957_v37 }
  0xe2   : > { %v332_v26 = vunpack.c.l.b16 %v331_v25  ;;  %v333_v27 = vunpack.c.h.b16 %v331_v25 }
  0xe4   : > { %526 = vrot.lane.b32.xlu1 %v522_v36, %s1763_s30 }
  0xe5   : > { %647 = vrot.lane.b32.xlu0 %v644_v34, %s1765_s28 }
  0xe9   : > { %503 = vrot.lane.b32.xlu2 %v1357_v40, %s1754_s21 }
  0xec   : > { %649 = vrot.lane.b32.xlu1 %v645_v43, %s1765_s28 }
  0xf1   : > { %693 = vrot.lane.b32.xlu2 %v567_v45, %s1756_s8 }
  0xf9   : > { %546 = vrot.lane.b32.xlu2 %v543_v51, %s1761_s24 }
 0x101   : > { %524 = vrot.lane.b32.xlu2 %v521_v39, %s1763_s30 }
 0x109   : > { %709 = vrot.lane.b32.xlu2 %v2079_v63, %s1756_s8 }
 0x11b   : > { %v551_v55 = vpop.permute.xlu2 %550 }
 0x11c   : > { %689 = vrot.lane.b32.xlu2 %v551_v55, %s1756_s8 }
 0x123   : > { %v529_v56 = vpop.permute.xlu2 %528 }
 0x124   : > { %683 = vrot.lane.b32.xlu1 %v529_v56, %s1756_s8 }
 0x12b   : > { %v604_v1 = vpop.permute.xlu2 %603 }
 0x12c   : > { %703 = vrot.lane.b32.xlu2 %v604_v1, %s1756_s8 }
 0x133   : > { %v582_v4 = vpop.permute.xlu2 %581 }
 0x134   : > { %697 = vrot.lane.b32.xlu2 %v582_v4, %s1756_s8 }
 0x136   : > { %v608_v5 = vpop.permute.xlu1 %607 }
 0x137   : > { %v606_v6 = vpop.permute.xlu0 %605 }
 0x138   : > { %v611_v63 = vsel %vm2473_vm15, %v606_v6, %v608_v5  ;;  %v610_v7 = vsel %vm2473_vm15, %v604_v1, %v606_v6  ;;  %vm337_vm15 = vcmp.ne.s32.totalorder %v333_v27, %v1960_v38  ;;  %v855_v5 = vld [vmem:[#allocation3 + $0x1c] sm:$0xf] }
 0x139   : > { %707 = vrot.lane.b32.xlu1 %v611_v63, %s1756_s8  ;;  %705 = vrot.lane.b32.xlu0 %v610_v7, %s1756_s8  ;;  %v867_v6 = vsel %vm2075_vm7, %v855_v5, 0  ;;  %v1426_v63 = vld [vmem:[#allocation3 + $0xc] sm:$0xf]  ;;  %v1461_v7 = vld [vmem:[#allocation3 + $0x18] sm:$0xf0] }
 0x13b   : > { %v2155_v8 = vpop.permute.xlu2 %651 }
 0x13e   : > { %v586_v10 = vpop.permute.xlu1 %585 }
 0x13f   : > { %v584_v12 = vpop.permute.xlu0 %583 }
 0x140   : > { %v589_v14 = vsel %vm2472_vm1, %v584_v12, %v586_v10  ;;  %v588_v15 = vsel %vm2472_vm1, %v582_v4, %v584_v12  ;;  %vm336_vm1 = vcmp.ne.s32.totalorder %v332_v26, %v1957_v37  ;;  %v853_v4 = vld [vmem:[#allocation3 + $0xc] sm:$0xf]  ;;  %v1029_v10 = vunpack.c.l.b16 %v867_v6 }
 0x141   : > { %701 = vrot.lane.b32.xlu1 %v589_v14, %s1756_s8  ;;  %699 = vrot.lane.b32.xlu0 %v588_v15, %s1756_s8  ;;  %vm2176_vm3 = vmpackc.low %vm337_vm15, %vm336_vm1  ;;  %vm2512_vm15 = vcmask 916480   ;;  %vm653_vm1 = vcmask 769024   ;;  %v1427_v12 = vor.u32 %v1461_v7, %v1426_v63  ;;  %v861_v15 = vsel %vm1993_vm0, %v853_v4, 0 }
 0x142   : > { %v346_v34 = vsel %vm2176_vm3, %v2085_v54, 0  ;;  %v348_v40 = vsel %vm2176_vm3, %v2087_v59, 0  ;;  %v984_v60 = vunpack.c.l.b16 %v861_v15  ;;  %v1398_v15 = vld [vmem:[#allocation3] sm:$0xf] }
 0x143   : > { %v504_v16 = vpop.permute.xlu2 %503  ;;  %v485_v45 = vunpack.c.h.b16 %v348_v40  ;;  %v481_v1 = vunpack.c.l.b16 %v346_v34 }
 0x146   : > { %v714_v17 = vpop.permute.xlu1 %713 }
 0x147   : > { %v712_v19 = vpop.permute.xlu0 %711 }
 0x148   : > { %v736_v22 = vsel %vm2475_vm12, %v712_v19, %v714_v17  ;;  %vm344_vm12 = vcmp.ne.s32.totalorder %v340_v29, %v1960_v38 }
 0x149   : > { %675 = vrot.lane.b32.xlu0 %v510_v20, %s1756_s8  ;;  %789 = vmatpush.bf16.msra.mxu2 %v736_v22  ;;  %vm2180_vm4 = vmpackc.low %vm344_vm12, %vm343_vm13  ;;  %vm2510_vm12 = vcmask 1039360   ;;  %vm2511_vm13 = vcmask 138240   ;;  %v859_v20 = vsel %vm2042_vm11, %v855_v5, 0 }
 0x14a   : > { %v347_v37 = vsel %vm2180_vm4, %v1967_v46, 0  ;;  %v349_v38 = vsel %vm2180_vm4, %v1969_v47, 0  ;;  %v482_v46 = vunpack.c.h.b16 %v346_v34  ;;  %v509_v59 = vsel %vm2510_vm12, %v504_v16, %v2150_v3 }
 0x14b   : > { %v2166_v24 = vpop.permute.xlu2 %693  ;;  %v483_v42 = vunpack.c.l.b16 %v347_v37  ;;  %v486_v43 = vunpack.c.l.b16 %v349_v38  ;;  %v863_v16 = vsel %vm1993_vm0, %v855_v5, 0  ;;  %v966_v25 = vunpack.c.l.b16 %v859_v20  ;;  %vm2513_vm0 = vmmov %vm2511_vm13 }
 0x14c   : > { %v488_v49 = vpack.c.b16 %v485_v45, %v482_v46  ;;  %v987_v61 = vunpack.c.l.b16 %v863_v16  ;;  %vm2516_vm12 = vmmov %vm2513_vm0  ;;  %v1455_v16 = vld [vmem:[#allocation3 + $0xc] sm:$0xf0] }
 0x14d   : > { %v489_v48 = vpack.c.b16 %v486_v43, %v483_v42 }
 0x14e   : > { %v549_v30 = vpop.permute.xlu1 %548  ;;  %v990_v17 = vpack.c.b16 %v987_v61, %v984_v60  ;;  %v1399_v60 = vor.u32 %v1455_v16, %v1398_v15 }
 0x14f   : > { %v554_v31 = vsel %vm2479_vm2, %v549_v30, %v551_v55  ;;  %vm530_vm2 = vcmask 1031168   ;;  %v696_v52 = vpop.permute.xlu0 %695 }
 0x150   : > { %687 = vrot.lane.b32.xlu1 %v554_v31, %s1756_s8 }
 0x153   : > { %v547_v9 = vpop.permute.xlu2 %546 }
 0x154   : > { %v553_v35 = vsel %vm2512_vm15, %v547_v9, %v549_v30  ;;  %vm2518_vm15 = vmmov %vm2513_vm0 }
 0x156   : > { %v527_v33 = vpop.permute.xlu1 %526 }
 0x157   : > { %v532_v36 = vsel %vm530_vm2, %v527_v33, %v529_v56  ;;  %v648_v55 = vpop.permute.xlu0 %647 }
 0x158   : > { %677 = vrot.lane.b32.xlu1 %v508_v2, %s1756_s8  ;;  %681 = vrot.lane.b32.xlu0 %v532_v36, %s1756_s8  ;;  %v484_v2 = vunpack.c.l.b16 %v348_v40 }
 0x15a   : > { %v487_v3 = vpack.c.b16 %v484_v2, %v481_v1  ;;  %v1452_v1 = vld [vmem:[#allocation8 + $0x4] sm:$0xf]  ;;  %v1390_v2 = vld [vmem:[#allocation8 + $0x8] sm:$0xf0] }
 0x15b   : > { %v525_v41 = vpop.permute.xlu2 %524  ;;  %v1393_v6 = vor.u32 %v1452_v1, %v1390_v2 }
 0x15c   : > { %v531_v54 = vsel %vm530_vm2, %v525_v41, %v527_v33 }
 0x15d   : > { %679 = vrot.lane.b32.xlu2 %v531_v54, %s1756_s8 }
 0x15e   : > { %v650_v39 = vpop.permute.xlu1 %649 }
 0x15f   : > { %v655_v56 = vsel %vm653_vm1, %v650_v39, %v2155_v8  ;;  %v654_v57 = vsel %vm653_vm1, %v648_v55, %v650_v39 }
 0x160   : > { %671 = vrot.lane.b32.xlu1 %v489_v48, %s1756_s8  ;;  %669 = vrot.lane.b32.xlu0 %v488_v49, %s1756_s8  ;;  %v1388_v48 = vld [vmem:[#allocation8] sm:$0xf]  ;;  %v1453_v49 = vld [vmem:[#allocation8 + $0x4] sm:$0xf0] }
 0x163   : > { %v710_v47 = vpop.permute.xlu2 %709 }
 0x164   : > { %v735_v51 = vsel %vm2511_vm13, %v710_v47, %v712_v19  ;;  %v857_v19 = vsel %vm2042_vm11, %v853_v4, 0  ;;  %vm2515_vm11 = vmmov %vm2513_vm0 }
 0x165   : > { %673 = vrot.lane.b32.xlu2 %v509_v59, %s1756_s8  ;;  %761 = vmatpush.bf16.msra.mxu0 %v735_v51  ;;  %v963_v22 = vunpack.c.l.b16 %v857_v19  ;;  %vm2517_vm13 = vmmov %vm2513_vm0  ;;  %v821_v19 = vstv %s268_s6 }
 0x166   : > { %v730_v38 = vsel %vm2517_vm13, %v2166_v24, %v696_v52  ;;  %v1389_v52 = vor.u32 %v1453_v49, %v1388_v48  ;;  %vm2522_vm13 = vmmov %vm2513_vm0 }
 0x167   : > { %v969_v26 = vpack.c.b16 %v966_v25, %v963_v22 }
 0x168   : > { %685 = vrot.lane.b32.xlu1 %v553_v35, %s1756_s8  ;;  %691 = vrot.lane.b32.xlu0 %v2137_v44, %s1756_s8  ;;  %v865_v44 = vsel %vm2075_vm7, %v853_v4, 0  ;;  %vm2514_vm7 = vmmov %vm2513_vm0 }
 0x169   : > { %v1026_v8 = vunpack.c.l.b16 %v865_v44 }
 0x16b   : > { %v1032_v14 = vpack.c.b16 %v1029_v10, %v1026_v8 }
 0x16d   : > { %894 = vrot.lane.b32.xlu2 %v1399_v60, %s1754_s21 }
 0x170   : > { %719 = vrot.lane.b32.xlu1 %v655_v56, %s1756_s8  ;;  %717 = vrot.lane.b32.xlu0 %v654_v57, %s1756_s8 }
 0x176   : > { %v690_v58 = vpop.permute.xlu2 %689 }
 0x178   : > { %667 = vrot.lane.b32.xlu0 %v487_v3, %s1756_s8  ;;  %715 = vrot.lane.b32.xlu1 %v648_v55, %s1756_s8 }
 0x180   : > { %1037 = vrot.lane.b32.xlu0 %v1032_v14, %s1765_s28  ;;  %1016 = vrot.lane.b32.xlu1 %v1427_v12, %s1759_s12 }
 0x186   : > { %v704_v28 = vpop.permute.xlu2 %703 }
 0x188   : > { %995 = vrot.lane.b32.xlu1 %v990_v17, %s1762_s29 }
 0x18e   : > { %v698_v23 = vpop.permute.xlu2 %697 }
 0x190   : > { %974 = vrot.lane.b32.xlu1 %v969_v26, %s1764_s5 }
 0x196   : > { %v684_v27 = vpop.permute.xlu1 %683 }
 0x1ab   : > { %v708_v29 = vpop.permute.xlu1 %707  ;;  %v706_v30 = vpop.permute.xlu0 %705 }
 0x1ac   : > { %v733_v31 = vsel %vm2513_vm0, %v704_v28, %v706_v30  ;;  %v734_v9 = vsel %vm2514_vm7, %v706_v30, %v708_v29  ;;  %vm2519_vm7 = vmmov %vm2513_vm0 }
 0x1ad   : > { %762 = vmatpush.bf16.msra.mxu0 %v733_v31  ;;  %790 = vmatpush.bf16.msra.mxu2 %v734_v9 }
 0x1b3   : > { %v702_v33 = vpop.permute.xlu1 %701  ;;  %v700_v34 = vpop.permute.xlu0 %699 }
 0x1b4   : > { %v731_v36 = vsel %vm2515_vm11, %v698_v23, %v700_v34  ;;  %v732_v37 = vsel %vm2516_vm12, %v700_v34, %v702_v33  ;;  %vm2520_vm11 = vmmov %vm2513_vm0 }
 0x1b5   : > { %763 = vmatpush.bf16.msra.mxu0 %v731_v36  ;;  %791 = vmatpush.bf16.msra.mxu2 %v732_v37  ;;  %vm2521_vm12 = vmmov %vm2513_vm0 }
 0x1b7   : > { %v680_v35 = vpop.permute.xlu2 %679 }
 0x1b9   : > { %792 = vmatpush.bf16.msra.mxu2 %v730_v38 }
 0x1bb   : > { %v676_v40 = vpop.permute.xlu0 %675 }
 0x1bf   : > { %v674_v63 = vpop.permute.xlu2 %673 }
 0x1c2   : > { %v688_v41 = vpop.permute.xlu1 %687 }
 0x1c3   : > { %v728_v54 = vsel %vm2518_vm15, %v688_v41, %v690_v58  ;;  %vm2523_vm15 = vmmov %vm2513_vm0 }
 0x1c4   : > { %793 = vmatpush.bf16.msra.mxu2 %v728_v54 }
 0x1ca   : > { %v678_v42 = vpop.permute.xlu1 %677  ;;  %v682_v43 = vpop.permute.xlu0 %681 }
 0x1cb   : > { %v726_v46 = vsel %vm2513_vm0, %v682_v43, %v684_v27  ;;  %v724_v45 = vsel %vm2519_vm7, %v676_v40, %v678_v42  ;;  %v725_v5 = vsel %vm2523_vm15, %v680_v35, %v682_v43  ;;  %vm757_vm7 = vcmask 130048  }
 0x1cc   : > { %794 = vmatpush.bf16.msra.mxu2 %v726_v46 }
 0x1d0   : > { %795 = vmatpush.bf16.msra.mxu2 %v724_v45 }
 0x1d2   : > { %v672_v47 = vpop.permute.xlu1 %671  ;;  %v670_v59 = vpop.permute.xlu0 %669 }
 0x1d3   : > { %v722_v51 = vsel %vm2520_vm11, %v670_v59, %v672_v47  ;;  %vm2524_vm11 = vmmov %vm2513_vm0 }
 0x1d4   : > { %796 = vmatpush.bf16.msra.mxu2 %v722_v51 }
 0x1d7   : > { %797 = vmatmul.bf16.vlgmr.msra.gmra.mxu2 %v1389_v52 }
 0x1da   : > { %v686_v39 = vpop.permute.xlu1 %685  ;;  %v692_v55 = vpop.permute.xlu0 %691 }
 0x1db   : > { %v729_v56 = vsel %vm2521_vm12, %v692_v55, %v2166_v24  ;;  %v727_v57 = vsel %vm2522_vm13, %v686_v39, %v688_v41  ;;  %v723_v24 = vsel %vm2524_vm11, %v674_v63, %v676_v40  ;;  %vm2525_vm12 = vmmov %vm2513_vm0 }
 0x1dc   : > { %764 = vmatpush.bf16.msra.mxu0 %v729_v56  ;;  %vm2526_vm13 = vmmov %vm2513_vm0 }
 0x1e0   : > { %765 = vmatpush.bf16.msra.mxu0 %v727_v57 }
 0x1e2   : > { %v720_v3 = vpop.permute.xlu1 %719  ;;  %v718_v4 = vpop.permute.xlu0 %717 }
 0x1e3   : > { %v738_v44 = vsel %vm2513_vm0, %v718_v4, %v720_v3 }
 0x1e4   : > { %766 = vmatpush.bf16.msra.mxu0 %v725_v5  ;;  %810 = vmatpush.bf16.msrb.mxu2 %v738_v44 }
 0x1e7   : > { %1395 = vmatmul.msk.bf16.vlgmr.msrb.gmra.mxu2 %vm757_vm7, %v1393_v6 }
 0x1e8   : > { %767 = vmatpush.bf16.msra.mxu0 %v723_v24 }
 0x1ea   : > { %v716_v7 = vpop.permute.xlu1 %715  ;;  %v668_v8 = vpop.permute.xlu0 %667 }
 0x1eb   : > { %v721_v10 = vsel %vm2525_vm12, %v668_v8, %v670_v59  ;;  %v737_v12 = vsel %vm2526_vm13, %v716_v7, %v718_v4 }
 0x1ec   : > { %768 = vmatpush.bf16.msra.mxu0 %v721_v10  ;;  %782 = vmatpush.bf16.msra.mxu1 %v737_v12 }
 0x1ef   : > { %769 = vmatmul.bf16.vlgmr.msra.gmra.mxu0 %v1389_v52  ;;  %1394 = vmatmul.msk.bf16.vlgmr.msra.gmra.mxu1 %vm757_vm7, %v1393_v6 }
 0x25a   : > { %v798_v14 = vpop.f32.mrf.mxu2 }
 0x262   : > { %v800_v61 = vpop.f32.mrf.mxu2 }
 0x26a   : > { %v812_v17 = vpop.f32.mrf.mxu2 }
 0x26b   : > { %v813_v20 = vadd.f32 %v812_v17, %v798_v14 }
 0x26c   : > { %v770_v22 = vpop.f32.mrf.mxu0  ;;  %v784_v25 = vpop.f32.mrf.mxu1 }
 0x26d   : > { %v823_v26 = vmul.f32 %v821_v19, %v813_v20  ;;  %v785_v58 = vadd.f32 %v784_v25, %v770_v22  ;;  %vm818_vm15 = vcmp.ge.f32.partialorder %v813_v20, 0.0 }
 0x26f   : > { %vm817_vm0 = vcmp.ge.f32.partialorder %v785_v58, 0.0  ;;  %v822_v27 = vmul.f32 %v821_v19, %v785_v58  ;;  %v827_v28 = vsel %vm818_vm15, %v813_v20, %v823_v26 }
 0x271   : > { %v826_v29 = vsel %vm817_vm0, %v785_v58, %v822_v27 }
 0x272   : > { %v2255_v30 = vpack.c.bf16 %v827_v28, %v826_v29  ;;  %v814_v31 = vpop.f32.mrf.mxu2 }
 0x273   : > { %v815_v9 = vadd.f32 %v814_v31, %v800_v61 }
 0x274   : > { %832 = vst [vmem:[#allocation3 + $0x4] sm:$0xff] %v2255_v30  ;;  %v772_v23 = vpop.f32.mrf.mxu0  ;;  %v786_v33 = vpop.f32.mrf.mxu1  ;;  %v2263_v54 = vsel %vm2111_vm5, %v2255_v30, 0  ;;  %v856_v53 = vsel %vm2032_vm10, %v2255_v30, 0 }
 0x275   : > { %v825_v34 = vmul.f32 %v821_v19, %v815_v9  ;;  %v787_v36 = vadd.f32 %v786_v33, %v772_v23  ;;  %vm820_vm11 = vcmp.ge.f32.partialorder %v815_v9, 0.0  ;;  %v1024_v43 = vunpack.c.l.b16 %v2263_v54 }
 0x277   : > { %vm819_vm12 = vcmp.ge.f32.partialorder %v787_v36, 0.0  ;;  %v824_v37 = vmul.f32 %v821_v19, %v787_v36  ;;  %v829_v38 = vsel %vm820_vm11, %v815_v9, %v825_v34 }
 0x279   : > { %v828_v40 = vsel %vm819_vm12, %v787_v36, %v824_v37  ;;  %v860_v37 = vsel %vm1987_vm14, %v2255_v30, 0 }
 0x27a   : > { %v2258_v41 = vpack.c.bf16 %v829_v38, %v828_v40 }
 0x27b   : > { %v2273_v48 = vld [vmem:[#allocation3 + $0x8] sm:$0xf]  ;;  %v1418_v49 = vld [vmem:[#allocation3 + $0x4] sm:$0xf] }
 0x27c   : > { %833 = vst [vmem:[#allocation3 + $0x14] sm:$0xff] %v2258_v41  ;;  %v2269_v42 = vsel %vm2111_vm5, %v2258_v41, 0  ;;  %v1459_v47 = vld [vmem:[#allocation3 + $0x8] sm:$0xf]  ;;  %v847_v52 = vsel %vm1973_vm9, %v2273_v48, 0  ;;  %v834_v55 = vld [vmem:[#allocation3] sm:$0xff] }
 0x27d   : > { %v1027_v46 = vunpack.c.l.b16 %v2269_v42  ;;  %v929_v1 = vunpack.c.l.b16 %v847_v52  ;;  %v838_v3 = vsel %vm2176_vm3, %v834_v55, 0  ;;  %v839_v50 = vsel %vm2180_vm4, %v2273_v48, 0  ;;  %v1410_v7 = vld [vmem:[#allocation3 + $0x4] sm:$0xf]  ;;  %v1457_v15 = vld [vmem:[#allocation3 + $0x8] sm:$0xf] }
 0x27e   : > { %v873_v8 = vunpack.c.h.b16 %v838_v3  ;;  %v872_v12 = vunpack.c.l.b16 %v838_v3  ;;  %v846_v16 = vsel %vm2081_vm8, %v834_v55, 0  ;;  %v2301_v60 = vunpack.c.l.b16 %v839_v50  ;;  %v1406_v28 = vld [vmem:[#allocation3 + $0x8] sm:$0xf]  ;;  %v1454_v29 = vld [vmem:[#allocation3 + $0x4] sm:$0xf] }
 0x27f   : > { %v1030_v45 = vpack.c.b16 %v1027_v46, %v1024_v43  ;;  %v927_v25 = vunpack.c.l.b16 %v846_v16  ;;  %v842_v31 = vsel %vm2115_vm6, %v834_v55, 0  ;;  %v862_v34 = vsel %vm1987_vm14, %v2258_v41, 0 }
 0x280   : > { %v906_v36 = vunpack.c.l.b16 %v842_v31  ;;  %v986_v38 = vunpack.c.h.b16 %v862_v34  ;;  %v985_v40 = vunpack.c.l.b16 %v862_v34  ;;  %v983_v43 = vunpack.c.h.b16 %v860_v37 }
 0x281   : > { %1033 = vrot.lane.b32.xlu1 %v1030_v45, %s1765_s28  ;;  %v982_v46 = vunpack.c.l.b16 %v860_v37  ;;  %v962_v52 = vunpack.c.h.b16 %v856_v53  ;;  %vm2528_vm14 = vcmask 777216   ;;  %vm2534_vm5 = vcmask 900096  }
 0x282   : > { %v989_v45 = vpack.c.b16 %v986_v38, %v983_v43  ;;  %vm2537_vm0 = vmmov %vm2534_vm5 }
 0x283   : > { %v1460_v59 = vld [vmem:[#allocation3 + $0x10] sm:$0xf0]  ;;  %v1420_v51 = vld [vmem:[#allocation3 + $0x14] sm:$0xf0] }
 0x284   : > { %v1419_v62 = vor.u32 %v1460_v59, %v1418_v49  ;;  %v1423_v35 = vor.u32 %v1459_v47, %v1420_v51  ;;  %v2279_v39 = vld [vmem:[#allocation3 + $0x18] sm:$0xf]  ;;  %v836_v57 = vld [vmem:[#allocation3 + $0x10] sm:$0xff]  ;;  %v988_v49 = vpack.c.b16 %v985_v40, %v982_v46  ;;  %v858_v47 = vsel %vm2032_vm10, %v2258_v41, 0  ;;  %vm2531_vm10 = vmmov %vm2528_vm14 }
 0x285   : > { %v849_v56 = vsel %vm1973_vm9, %v2279_v39, 0  ;;  %v1458_v4 = vld [vmem:[#allocation3 + $0x10] sm:$0xf0]  ;;  %v840_v44 = vsel %vm2176_vm3, %v836_v57, 0  ;;  %v841_v6 = vsel %vm2180_vm4, %v2279_v39, 0  ;;  %v848_v24 = vsel %vm2081_vm8, %v836_v57, 0 }
 0x286   : > { %1012 = vrot.lane.b32.xlu2 %v1419_v62, %s1759_s12  ;;  %1014 = vrot.lane.b32.xlu0 %v1423_v35, %s1759_s12  ;;  %v932_v2 = vunpack.c.l.b16 %v849_v56  ;;  %v1412_v63 = vld [vmem:[#allocation3 + $0x14] sm:$0xf0]  ;;  %v876_v10 = vunpack.c.h.b16 %v840_v44  ;;  %v875_v32 = vunpack.c.l.b16 %v840_v44  ;;  %v1411_v14 = vor.u32 %v1458_v4, %v1410_v7  ;;  %v1400_v58 = vld [vmem:[#allocation3 + $0x10] sm:$0xf0]  ;;  %v1038_v7 = vpop.permute.xlu0 %1037 }
 0x287   : > { %v2303_v11 = vunpack.c.l.b16 %v841_v6  ;;  %v1415_v61 = vor.u32 %v1457_v15, %v1412_v63  ;;  %v930_v17 = vunpack.c.l.b16 %v848_v24  ;;  %v1456_v26 = vld [vmem:[#allocation3 + $0x14] sm:$0xf0]  ;;  %v844_v27 = vsel %vm2115_vm6, %v836_v57, 0  ;;  %v895_v6 = vpop.permute.xlu2 %894  ;;  %v1017_v63 = vpop.permute.xlu1 %1016 }
 0x288   : > { %v935_v5 = vpack.c.b16 %v932_v2, %v929_v1  ;;  %v2305_v19 = vpack.c.b16 %v876_v10, %v873_v8  ;;  %v2307_v20 = vpack.c.b16 %v875_v32, %v872_v12  ;;  %v1407_v9 = vor.u32 %v1456_v26, %v1406_v28 }
 0x289   : > { %v880_v22 = vpack.c.b16 %v2303_v11, %v2301_v60  ;;  %v933_v0 = vpack.c.b16 %v930_v17, %v927_v25  ;;  %v1403_v23 = vor.u32 %v1454_v29, %v1400_v58  ;;  %v909_v33 = vunpack.c.l.b16 %v844_v27 }
 0x28a   : > { %940 = vrot.lane.b32.xlu1 %v935_v5, %s1761_s24  ;;  %v965_v59 = vunpack.c.h.b16 %v858_v47  ;;  %v964_v51 = vunpack.c.l.b16 %v858_v47  ;;  %v961_v62 = vunpack.c.l.b16 %v856_v53  ;;  %v1028_v41 = vunpack.c.h.b16 %v2269_v42 }
 0x28b   : > { %v912_v21 = vpack.c.b16 %v909_v33, %v906_v36  ;;  %v931_v56 = vunpack.c.h.b16 %v848_v24  ;;  %v1025_v57 = vunpack.c.h.b16 %v2263_v54  ;;  %v928_v1 = vunpack.c.h.b16 %v846_v16 }
 0x28c   : > { %v968_v35 = vpack.c.b16 %v965_v59, %v962_v52  ;;  %v967_v55 = vpack.c.b16 %v964_v51, %v961_v62  ;;  %vm2527_vm9 = vnez %v2493_v13  ;;  %v910_v42 = vunpack.c.h.b16 %v844_v27 }
 0x28d   : > { %v1031_v2 = vpack.c.b16 %v1028_v41, %v1025_v57  ;;  %v934_v3 = vpack.c.b16 %v931_v56, %v928_v1  ;;  %v845_v18 = vsel %vm2527_vm9, %v2279_v39, 0  ;;  %v843_v30 = vsel %vm2527_vm9, %v2273_v48, 0 }
 0x28e   : > { %952 = vrot.lane.b32.xlu2 %v1411_v14, %s1760_s23  ;;  %954 = vrot.lane.b32.xlu0 %v1415_v61, %s1760_s23  ;;  %v911_v4 = vunpack.c.l.b16 %v845_v18  ;;  %v908_v5 = vunpack.c.l.b16 %v843_v30  ;;  %v907_v44 = vunpack.c.h.b16 %v842_v31  ;;  %vm2529_vm3 = vcmask 908288  }
 0x28f   : > { %v996_v24 = vpop.permute.xlu1 %995  ;;  %vm2530_vm4 = vcmask 1039360   ;;  %vm2532_vm6 = vcmask 785408   ;;  %vm2533_vm8 = vcmask 916480  }
 0x290   : > { %v914_v54 = vpack.c.b16 %v911_v4, %v908_v5  ;;  %v913_v50 = vpack.c.b16 %v910_v42, %v907_v44  ;;  %vm2535_vm13 = vmmov %vm2532_vm6 }
 0x291   : > { %vm2536_vm15 = vmmov %vm2533_vm8 }
 0x292   : > { %936 = vrot.lane.b32.xlu1 %v933_v0, %s1761_s24  ;;  %vm2538_vm11 = vmmov %vm2530_vm4 }
 0x296   : > { %898 = vrot.lane.b32.xlu0 %v1407_v9, %s1754_s21  ;;  %896 = vrot.lane.b32.xlu2 %v1403_v23, %s1754_s21  ;;  %s2423_s21 = scalar_lea.vmem [#allocation12], %s1348_s9  ;;  %s1464_s9 = sshll.u32 %s1814_s19, 5 }
 0x297   : > { %v975_v13 = vpop.permute.xlu1 %974  ;;  %s1230_s10 = scalar_lea.hbm %s2470_s4, %s1464_s9  ;;  %s1231_s11 = sshll.u32 %s2423_s21, 4  ;;  %s1232_s11 = int_to_ptr.vmem [resolvable:$true] %s1231_s11 }
 0x298   : > { %s1233_s12 = sshll.u32 %s1230_s10, 4  ;;  %s1219_s19 = scalar_lea.sflag [#allocation6], %s1904_s7  ;;  %s1234_s12 = int_to_ptr.hbm [resolvable:$true] %s1233_s12 }
 0x299   : > { %s1684_s23 = sshra.s32 %s1234_s12, 4  ;;  %s1685_s23 = int_to_ptr.hbm [resolvable:$true] %s1684_s23 }
 0x29a   : > { %915 = vrot.lane.b32.xlu1 %v912_v21, %s1763_s30  ;;  %p1691_p11 = scmp.lt.s32.totalorder %s1685_s23, %s2470_s4 }
 0x29e   : > { %993 = vrot.lane.b32.xlu0 %v989_v45, %s1762_s29  ;;  %991 = vrot.lane.b32.xlu2 %v988_v49, %s1762_s29 }
 0x2a6   : > { %972 = vrot.lane.b32.xlu0 %v968_v35, %s1764_s5  ;;  %970 = vrot.lane.b32.xlu2 %v967_v55, %s1764_s5 }
 0x2ae   : > { %1035 = vrot.lane.b32.xlu2 %v1031_v2, %s1765_s28  ;;  %938 = vrot.lane.b32.xlu0 %v934_v3, %s1761_s24  ;;  %s1686_s24 = scalar_lea.hbm %s1685_s23, 32 }
 0x2af   : > { %p1687_p1 = scmp.ne.s32.totalorder %s1685_s23, %s1686_s24 }
 0x2b1   : > { %p1688_p4 = pnand %p1687_p1, %p1876_p7 }
 0x2b3   : > { %p1689_p8 = pneg %p1688_p4 }
 0x2b6   : > { %919 = vrot.lane.b32.xlu0 %v914_v54, %s1763_s30  ;;  %917 = vrot.lane.b32.xlu2 %v913_v50, %s1763_s30  ;;  %v1462_v54 = vld [vmem:[#allocation10 + $0x4] sm:$0xf]  ;;  %v1432_v50 = vld [vmem:[#allocation10 + $0x8] sm:$0xf0]  ;;  %s1690_s30 = scalar_lea.hbm %s2470_s4, 64 }
 0x2b7   : > { %p1692_p9 = scmp.lt.s32.totalorder %s1690_s30, %s1686_s24 }
 0x2b9   : > { %p1693_p2 = por %p1692_p9, %p1691_p11 }
 0x2bb   : > { %p1694_p10 = pnand %p1693_p2, %p1689_p8 }
 0x2e0   : > { %v1013_v39 = vpop.permute.xlu2 %1012 }
 0x2e1   : > { %1094 = vrot.lane.b32.xlu2 %v1013_v39, %s1756_s8 }
 0x2e8   : > { %v953_v8 = vpop.permute.xlu2 %952 }
 0x2f0   : > { %v897_v32 = vpop.permute.xlu2 %896 }
 0x2f1   : > { %v900_v49 = vsel %vm2538_vm11, %v895_v6, %v897_v32 }
 0x2f3   : > { %v1034_v12 = vpop.permute.xlu1 %1033 }
 0x2f8   : > { %v1015_v48 = vpop.permute.xlu0 %1014  ;;  %v992_v25 = vpop.permute.xlu2 %991 }
 0x2f9   : > { %v1019_v10 = vsel %vm2528_vm14, %v1015_v48, %v1017_v63  ;;  %v1018_v26 = vsel %vm2531_vm10, %v1013_v39, %v1015_v48 }
 0x2fa   : > { %1098 = vrot.lane.b32.xlu2 %v1019_v10, %s1756_s8 }
 0x2fc   : > { %v941_v61 = vpop.permute.xlu1 %940 }
 0x300   : > { %v955_v14 = vpop.permute.xlu0 %954  ;;  %v971_v58 = vpop.permute.xlu2 %970 }
 0x301   : > { %1080 = vrot.lane.b32.xlu1 %v955_v14, %s1756_s8  ;;  %v956_v15 = vsel %vm2529_vm3, %v953_v8, %v955_v14 }
 0x302   : > { %1078 = vrot.lane.b32.xlu0 %v956_v15, %s1756_s8 }
 0x304   : > { %v937_v37 = vpop.permute.xlu1 %936 }
 0x308   : > { %v899_v16 = vpop.permute.xlu0 %898  ;;  %v1036_v28 = vpop.permute.xlu2 %1035 }
 0x309   : > { %1076 = vrot.lane.b32.xlu1 %v953_v8, %s1756_s8  ;;  %v901_v17 = vsel %vm2530_vm4, %v897_v32, %v899_v16  ;;  %v1039_v45 = vsel %vm653_vm1, %v1034_v12, %v1036_v28 }
 0x30a   : > { %1074 = vrot.lane.b32.xlu0 %v941_v61, %s1756_s8  ;;  %1060 = vrot.lane.b32.xlu2 %v901_v17, %s1756_s8 }
 0x30c   : > { %v916_v21 = vpop.permute.xlu1 %915 }
 0x310   : > { %v994_v0 = vpop.permute.xlu0 %993  ;;  %v918_v23 = vpop.permute.xlu2 %917 }
 0x311   : > { %1096 = vrot.lane.b32.xlu1 %v1018_v26, %s1756_s8  ;;  %v998_v31 = vsel %vm2532_vm6, %v994_v0, %v996_v24  ;;  %v997_v38 = vsel %vm2535_vm13, %v992_v25, %v994_v0  ;;  %v921_v46 = vsel %vm530_vm2, %v916_v21, %v918_v23 }
 0x312   : > { %1088 = vrot.lane.b32.xlu2 %v992_v25, %s1756_s8 }
 0x318   : > { %v973_v27 = vpop.permute.xlu0 %972 }
 0x319   : > { %1082 = vrot.lane.b32.xlu1 %v971_v58, %s1756_s8  ;;  %v977_v34 = vsel %vm2534_vm5, %v973_v27, %v975_v13  ;;  %v976_v43 = vsel %vm2537_vm0, %v971_v58, %v973_v27 }
 0x31a   : > { %1100 = vrot.lane.b32.xlu2 %v1034_v12, %s1756_s8 }
 0x320   : > { %v939_v29 = vpop.permute.xlu0 %938 }
 0x321   : > { %1092 = vrot.lane.b32.xlu1 %v998_v31, %s1756_s8  ;;  %v943_v9 = vsel %vm2533_vm8, %v939_v29, %v941_v61  ;;  %v942_v40 = vsel %vm2536_vm15, %v937_v37, %v939_v29  ;;  %v1463_v61 = vld [vmem:[#allocation10 + $0x4] sm:$0xf0]  ;;  %v1205_v37 = vstv %s1353_s13 }
 0x322   : > { %1072 = vrot.lane.b32.xlu2 %v943_v9, %s1756_s8 }
 0x328   : > { %v920_v33 = vpop.permute.xlu0 %919 }
 0x329   : > { %1068 = vrot.lane.b32.xlu0 %v920_v33, %s1756_s8  ;;  %1086 = vrot.lane.b32.xlu1 %v977_v34, %s1756_s8  ;;  %v922_v36 = vsel %vm530_vm2, %v918_v23, %v920_v33  ;;  %vm2539_vm2 = vcmask 138240   ;;  %v1561_v34 = vld [vmem:[%s1910_s14] sm:$0xff] }
 0x32a   : > { %1066 = vrot.lane.b32.xlu2 %v922_v36, %s1756_s8 }
 0x331   : > { %1090 = vrot.lane.b32.xlu0 %v997_v38, %s1756_s8  ;;  %1070 = vrot.lane.b32.xlu1 %v942_v40, %s1756_s8 }
 0x332   : > { %1054 = vrot.lane.b32.xlu2 %v2305_v19, %s1756_s8  ;;  %v1040_v19 = vsel %vm653_vm1, %v1036_v28, %v1038_v7  ;;  %vm2540_vm1 = vmmov %vm2539_vm2  ;;  %v1435_v7 = vor.u32 %v1462_v54, %v1432_v50 }
 0x333   : > { %vm2541_vm12 = vmmov %vm2540_vm1 }
 0x334   : > { %vm2542_vm9 = vmmov %vm2540_vm1 }
 0x335   : > { %vm2543_vm14 = vmmov %vm2540_vm1 }
 0x336   : > { %vm2544_vm3 = vmmov %vm2540_vm1 }
 0x337   : > { %vm2545_vm4 = vmmov %vm2540_vm1 }
 0x338   : > { %vm2546_vm10 = vmmov %vm2540_vm1 }
 0x339   : > { %1084 = vrot.lane.b32.xlu0 %v976_v43, %s1756_s8  ;;  %1064 = vrot.lane.b32.xlu1 %v921_v46, %s1756_s8  ;;  %vm2547_vm6 = vmmov %vm2540_vm1  ;;  %v1562_v46 = vld [vmem:[%s1910_s14 + $0x10] sm:$0xff] }
 0x33a   : > { %1052 = vrot.lane.b32.xlu2 %v2307_v20, %s1756_s8  ;;  %vm2548_vm8 = vmmov %vm2540_vm1 }
 0x33b   : > { %v1095_v20 = vpop.permute.xlu2 %1094  ;;  %vm2549_vm5 = vmmov %vm2540_vm1 }
 0x33c   : > { %vm2550_vm13 = vmmov %vm2540_vm1 }
 0x33d   : > { %vm2551_vm15 = vmmov %vm2540_vm1 }
 0x33e   : > { %vm2552_vm0 = vmmov %vm2540_vm1 }
 0x33f   : > { %vm2553_vm11 = vmmov %vm2552_vm0 }
 0x341   : > { %1102 = vrot.lane.b32.xlu0 %v1039_v45, %s1756_s8  ;;  %1058 = vrot.lane.b32.xlu1 %v900_v49, %s1756_s8 }
 0x349   : > { %1062 = vrot.lane.b32.xlu0 %v899_v16, %s1756_s8  ;;  %v1430_v16 = vld [vmem:[#allocation10] sm:$0xf] }
 0x34a   : > { %v1431_v25 = vor.u32 %v1463_v61, %v1430_v16 }
 0x351   : > { %1056 = vrot.lane.b32.xlu0 %v880_v22, %s1756_s8 }
 0x354   : > { %v1099_v53 = vpop.permute.xlu2 %1098 }
 0x359   : > { %1104 = vrot.lane.b32.xlu0 %v1040_v19, %s1756_s8 }
 0x364   : > { %v2396_v51 = vpop.permute.xlu2 %1060 }
 0x36c   : > { %v1089_v55 = vpop.permute.xlu2 %1088 }
 0x373   : > { %v1081_v47 = vpop.permute.xlu1 %1080 }
 0x374   : > { %v1079_v35 = vpop.permute.xlu0 %1078  ;;  %v1101_v11 = vpop.permute.xlu2 %1100 }
 0x375   : > { %v1115_v0 = vsel %vm2551_vm15, %v1079_v35, %v1081_v47 }
 0x37b   : > { %v1077_v59 = vpop.permute.xlu1 %1076 }
 0x37c   : > { %v1075_v56 = vpop.permute.xlu0 %1074  ;;  %v1073_v1 = vpop.permute.xlu2 %1072  ;;  %v1114_v44 = vsel %vm2542_vm9, %v1077_v59, %v1079_v35 }
 0x37d   : > { %v1113_v58 = vsel %vm2552_vm0, %v1073_v1, %v1075_v56  ;;  %v1564_v56 = vld [vmem:[%s1910_s14 + $0x18] sm:$0xff] }
 0x383   : > { %v1097_v52 = vpop.permute.xlu1 %1096 }
 0x384   : > { %v1120_v62 = vsel %vm2539_vm2, %v1095_v20, %v1097_v52  ;;  %v1067_v30 = vpop.permute.xlu2 %1066  ;;  %v1121_v8 = vsel %vm2545_vm4, %v1097_v52, %v1099_v53  ;;  %vm2554_vm2 = vmmov %vm2552_vm0 }
 0x385   : > { %1145 = vmatpush.bf16.msrb.mxu1 %v1120_v62 }
 0x38b   : > { %v1083_v41 = vpop.permute.xlu1 %1082 }
 0x38c   : > { %v1055_v6 = vpop.permute.xlu2 %1054 }
 0x393   : > { %v1093_v60 = vpop.permute.xlu1 %1092 }
 0x394   : > { %v1053_v14 = vpop.permute.xlu2 %1052 }
 0x395   : > { %v1106_v17 = vsel %vm2550_vm13, %v1053_v14, %v1055_v6 }
 0x39b   : > { %v1069_v22 = vpop.permute.xlu0 %1068  ;;  %v1087_v57 = vpop.permute.xlu1 %1086 }
 0x39c   : > { %v1111_v27 = vsel %vm2553_vm11, %v1067_v30, %v1069_v22 }
 0x3a3   : > { %v1091_v2 = vpop.permute.xlu0 %1090  ;;  %v1071_v18 = vpop.permute.xlu1 %1070 }
 0x3a4   : > { %v1118_v3 = vsel %vm2540_vm1, %v1089_v55, %v1091_v2  ;;  %v1112_v63 = vsel %vm2543_vm14, %v1071_v18, %v1073_v1  ;;  %v1119_v10 = vsel %vm2547_vm6, %v1091_v2, %v1093_v60  ;;  %vm2555_vm1 = vmmov %vm2552_vm0 }
 0x3a5   : > { %1146 = vmatpush.bf16.msrb.mxu1 %v1118_v3 }
 0x3ab   : > { %v1085_v4 = vpop.permute.xlu0 %1084  ;;  %v1065_v5 = vpop.permute.xlu1 %1064 }
 0x3ac   : > { %v1116_v42 = vsel %vm2541_vm12, %v1083_v41, %v1085_v4  ;;  %v1110_v13 = vsel %vm2546_vm10, %v1065_v5, %v1067_v30  ;;  %v1117_v15 = vsel %vm2549_vm5, %v1085_v4, %v1087_v57  ;;  %vm2556_vm12 = vmmov %vm2552_vm0 }
 0x3ad   : > { %1147 = vmatpush.bf16.msrb.mxu1 %v1116_v42 }
 0x3b1   : > { %1148 = vmatpush.bf16.msrb.mxu1 %v1114_v44 }
 0x3b3   : > { %v1103_v39 = vpop.permute.xlu0 %1102  ;;  %v1059_v48 = vpop.permute.xlu1 %1058 }
 0x3b4   : > { %v1122_v24 = vsel %vm2544_vm3, %v1101_v11, %v1103_v39  ;;  %v1108_v32 = vsel %vm2548_vm8, %v1059_v48, %v2396_v51 }
 0x3b5   : > { %1149 = vmatpush.bf16.msrb.mxu1 %v1112_v63  ;;  %1166 = vmatpush.bf16.msra.mxu3 %v1122_v24 }
 0x3b8   : > { %1436 = vmatmul.msk.bf16.vlgmr.msra.gmra.mxu3 %vm757_vm7, %v1435_v7 }
 0x3b9   : > { %1173 = vmatpush.bf16.msrb.mxu3 %v1121_v8  ;;  %1150 = vmatpush.bf16.msrb.mxu1 %v1110_v13 }
 0x3bb   : > { %v1063_v12 = vpop.permute.xlu0 %1062 }
 0x3bc   : > { %v1109_v31 = vsel %vm2555_vm1, %v2396_v51, %v1063_v12  ;;  %v1563_v51 = vld [vmem:[%s1910_s14 + $0x8] sm:$0xff] }
 0x3bd   : > { %1174 = vmatpush.bf16.msrb.mxu3 %v1119_v10  ;;  %1151 = vmatpush.bf16.msrb.mxu1 %v1108_v32 }
 0x3c1   : > { %1175 = vmatpush.bf16.msrb.mxu3 %v1117_v15  ;;  %1152 = vmatpush.bf16.msrb.mxu1 %v1106_v17 }
 0x3c3   : > { %v1057_v26 = vpop.permute.xlu0 %1056 }
 0x3c4   : > { %1153 = vmatmul.bf16.vlgmr.msrb.gmra.mxu1 %v1431_v25  ;;  %v1107_v9 = vsel %vm2556_vm12, %v1055_v6, %v1057_v26 }
 0x3c5   : > { %1176 = vmatpush.bf16.msrb.mxu3 %v1115_v0 }
 0x3c9   : > { %1177 = vmatpush.bf16.msrb.mxu3 %v1113_v58 }
 0x3cb   : > { %v1105_v28 = vpop.permute.xlu0 %1104 }
 0x3cc   : > { %v1123_v29 = vsel %vm2554_vm2, %v1103_v39, %v1105_v28 }
 0x3cd   : > { %1178 = vmatpush.bf16.msrb.mxu3 %v1111_v27  ;;  %1194 = vmatpush.bf16.msrb.mxu0 %v1123_v29 }
 0x3d0   : > { %1437 = vmatmul.msk.bf16.vlgmr.msrb.gmra.mxu0 %vm757_vm7, %v1435_v7 }
 0x3d1   : > { %1179 = vmatpush.bf16.msrb.mxu3 %v1109_v31 }
 0x3d5   : > { %1180 = vmatpush.bf16.msrb.mxu3 %v1107_v9 }
 0x3d8   : > { %1181 = vmatmul.bf16.vlgmr.msrb.gmra.mxu3 %v1431_v25 }
 0x43b   : > { %v1168_v23 = vpop.f32.mrf.mxu3 }
 0x441   : > { %v1154_v33 = vpop.f32.mrf.mxu1 }
 0x442   : > { %v1155_v36 = vadd.f32 %v1561_v34, %v1154_v33 }
 0x443   : > { %v1170_v49 = vpop.f32.mrf.mxu3 }
 0x444   : > { %v1169_v38 = vadd.f32 %v1168_v23, %v1155_v36 }
 0x446   : > { %vm1201_vm9 = vcmp.ge.f32.partialorder %v1169_v38, 0.0  ;;  %v1206_v40 = vmul.f32 %v1205_v37, %v1169_v38 }
 0x448   : > { %v1210_v21 = vsel %vm1201_vm9, %v1169_v38, %v1206_v40 }
 0x449   : > { %1214 = vst [vmem:[%s2423_s21] sm:$0xff] %v1210_v21  ;;  %v1156_v43 = vpop.f32.mrf.mxu1 }
 0x44a   : > { %v1157_v45 = vadd.f32 %v1562_v46, %v1156_v43 }
 0x44c   : > { %v1171_v19 = vadd.f32 %v1170_v49, %v1157_v45 }
 0x44d   : > { %v1196_v53 = vpop.f32.mrf.mxu0 }
 0x44e   : > { %vm1203_vm7 = vcmp.ge.f32.partialorder %v1171_v19, 0.0  ;;  %v1208_v20 = vmul.f32 %v1205_v37, %v1171_v19 }
 0x450   : > { %v1212_v47 = vsel %vm1203_vm7, %v1171_v19, %v1208_v20 }
 0x451   : > { %1216 = vst [vmem:[%s2423_s21 + $0x10] sm:$0xff] %v1212_v47 }
 0x455   : > { %v1198_v11 = vpop.f32.mrf.mxu0 }
 0x45b   : > { %v1182_v59 = vpop.f32.mrf.mxu3 }
 0x45c   : > { %v1183_v52 = vadd.f32 %v1563_v51, %v1182_v59 }
 0x45e   : > { %v1197_v62 = vadd.f32 %v1196_v53, %v1183_v52 }
 0x460   : > { %vm1202_vm14 = vcmp.ge.f32.partialorder %v1197_v62, 0.0  ;;  %v1207_v35 = vmul.f32 %v1205_v37, %v1197_v62 }
 0x462   : > { %v1211_v55 = vsel %vm1202_vm14, %v1197_v62, %v1207_v35 }
 0x463   : > { %1215 = vst [vmem:[%s2423_s21 + $0x8] sm:$0xff] %v1211_v55  ;;  %v1184_v41 = vpop.f32.mrf.mxu3 }
 0x464   : > { %v1185_v60 = vadd.f32 %v1564_v56, %v1184_v41 }
 0x466   : > { %v1199_v22 = vadd.f32 %v1198_v11, %v1185_v60 }
 0x468   : > { %vm1204_vm3 = vcmp.ge.f32.partialorder %v1199_v22, 0.0  ;;  %v1209_v57 = vmul.f32 %v1205_v37, %v1199_v22 }
 0x46a   : > { %v1213_v1 = vsel %vm1204_vm3, %v1199_v22, %v1209_v57 }
 0x46b   : > { %1217 = vst [vmem:[%s2423_s21 + $0x18] sm:$0xff] %v1213_v1 }
 0x46c   : > { %1697 = shalt.err (!%p1694_p10)
}
 0x46d   : > { %s1766_s7 = smov 256   ;;  %s1767_s6 = smov 16  }
 0x46e   : > { %1479 = dma.vmem_to_hbm [thread:$0]  (%p1876_p7), %s1232_s11, 512, %s1234_s12, %s1219_s19, %s1766_s7, %s1766_s7, %s1767_s6  }
 0x46f PF: > { %s1248_s13 = sand.u32 1, %s1732_s15   ;;  %p2557_p12 = scmp.ge.s32.totalorder %s1744_s18, 2 }
 0x470   : > { %s1249_s21 = scalar_lea.sflag [#allocation6], %s1248_s13 }
 0x471   : > { %p1496_p13 = pnand %p2557_p12, %p1828_p6 }
 0x473   : > { %p1497_p0 = pneg %p1496_p13 }
 0x475   : > { %1727 = dma.done.wait (%p1497_p0), %s1249_s21, 512  }
 0x476   : > { %1729 = vsyncadd (%p1497_p0), %s1249_s21, 4294966784  ;;  %p19_p3 = scmp.ge.s32.totalorder %s1862_s20, 4   ;;  %s2558_s15 = smov %s1736_s16 }
 0x477   : > { %s2559_s16 = smov %s1740_s17  ;;  %s2560_s17 = smov %s1872_s25 }
 0x478   : > { %s2561_s18 = smov %s1862_s20  ;;  %21 = sbr.rel (!%p19_p3) target bundleno = 7 (0x7), region = 94 }
 0x47d   :  { %1255 = vsyncpa [#allocation5], 1 }
 0x47e   :  { %1257 = vsyncpa [#allocation5 + $0x1], 1 }
 0x47f   :  { %1258 = vsyncpa [#allocation9], 1 }
 0x480   :  { %1259 = vsyncpa [#allocation6], 1 }
 0x481   :  { %1261 = vsyncpa [#allocation6 + $0x1], 1 }
 0x482   :  { %1262 = vsyncpa [#allocation7], 1 }
 0x483   :  { %1264 = vsyncpa [#allocation7 + $0x1], 1 }

</bundles_post_ra>
